<compile_context>
chip_gen: v7x
topology: tpu7x:2x2x1
jax: 0.10.0
libtpu: 0.0.40
codegen_flags: <defaults>
</compile_context>

<pallas_src>
import jax
import jax.numpy as jnp
from jax.experimental import pallas as pl
from jax.experimental.pallas import tpu as pltpu

IMG_DIM = 28 * 28          # 784
IMG_PAD = 7 * 128          # 896  (lane-dense padding of the fc1 K dim)
H_DIM = 400
Z_DIM = 20
HEAD_PAD = 128             # fused mu|logvar head padded to one lane tile
MAX_TB = 512               # batch-tile cap (multiple of 8)


def _round_up(n, m):
    return ((n + m - 1) // m) * m


# -----------------------------------------------------------------------------
# Kernel: one batch tile of the whole forward pass.
#   x_ref    : (TB, 896)  bf16  (zero-padded flattened images)
#   w1_ref   : (896, 400) bf16,  b1_ref : (1, 400) f32
#   wh_ref   : (400, 128) bf16,  bh_ref : (1, 128) f32   (fused fc21|fc22, padded)
#   w3_ref   : (20, 400)  bf16,  b3_ref : (1, 400) f32
#   w4_ref   : (400, 784) bf16,  b4_ref : (1, 784) f32
#   eps_ref  : (TB, 20)   f32
# Outputs:
#   recon_ref: (TB, 784)  f32
#   head_ref : (TB, 128)  f32   (mu = [:, :20], logvar = [:, 20:40])
# -----------------------------------------------------------------------------
def _vae_kernel(x_ref, w1_ref, b1_ref, wh_ref, bh_ref, w3_ref, b3_ref,
                w4_ref, b4_ref, eps_ref, recon_ref, head_ref):
    x = x_ref[...]                                             # (TB, 896) bf16

    # ---- encode: fc1 + ReLU (bf16 x bf16 MXU, f32 accumulate) ----
    h1 = jnp.dot(x, w1_ref[...], preferred_element_type=jnp.float32) + b1_ref[...]
    h1 = jnp.maximum(h1, 0.0)                                  # (TB, 400) f32

    # ---- fused fc21 / fc22 head (padded to 128 cols) ----
    head = jnp.dot(h1.astype(jnp.bfloat16), wh_ref[...],
                   preferred_element_type=jnp.float32) + bh_ref[...]   # (TB, 128)
    mu = head[:, :Z_DIM]
    logvar = head[:, Z_DIM:2 * Z_DIM]

    # ---- reparameterize (f32 elementwise; v5e has no bf16 VPU/EUP) ----
    z = mu + eps_ref[...] * jnp.exp(0.5 * logvar)              # (TB, 20)

    # ---- decode: fc3 + ReLU, fc4 + sigmoid ----
    h3 = jnp.dot(z.astype(jnp.bfloat16), w3_ref[...],
                 preferred_element_type=jnp.float32) + b3_ref[...]
    h3 = jnp.maximum(h3, 0.0)                                  # (TB, 400)

    logits = jnp.dot(h3.astype(jnp.bfloat16), w4_ref[...],
                     preferred_element_type=jnp.float32) + b4_ref[...]  # (TB, 784)

    recon_ref[...] = jax.nn.sigmoid(logits)
    head_ref[...] = head


# -----------------------------------------------------------------------------
# Batch tiling: cap TB at MAX_TB, keep it a multiple of 8, guarantee >=2 grid
# steps for moderately large batches (feeds both v7x TensorCores), and pick TB
# so that batch padding is minimized (e.g. B=300 -> TB=152, B_pad=304).
# -----------------------------------------------------------------------------
def _choose_tiling(B):
    b_round = _round_up(B, 8)
    num_tiles = pl.cdiv(b_round, MAX_TB)
    if b_round >= 128:                       # enough rows to be worth splitting
        num_tiles = max(num_tiles, 2)        # v7x: keep both TensorCores busy
    TB = _round_up(pl.cdiv(b_round, num_tiles), 8)
    return TB, num_tiles, TB * num_tiles


# -----------------------------------------------------------------------------
# Wrapper
# -----------------------------------------------------------------------------
def vae_forward(x_nchw, kparams, eps):
    """x_nchw: (B, 1, 28, 28) f32, eps: (B, 20) f32.
    Returns (recon (B, 784) f32, mu (B, 20) f32, logvar (B, 20) f32)."""
    B = x_nchw.shape[0]
    TB, num_tiles, B_pad = _choose_tiling(B)

    # reshape + pad (lane-dense 896 K dim, batch pad) + bf16 cast in one shot.
    x = x_nchw.reshape(B, IMG_DIM)
    x = jnp.pad(x, ((0, B_pad - B), (0, IMG_PAD - IMG_DIM))).astype(jnp.bfloat16)
    eps = jnp.pad(eps.astype(jnp.float32), ((0, B_pad - B), (0, 0)))

    w1, b1, wh, bh, w3, b3, w4, b4 = kparams

    def batch_tiled(tail):
        return pl.BlockSpec((TB,) + tail, lambda i: (i,) + (0,) * len(tail))

    def resident(shape):                       # weights/biases: one block, reused
        return pl.BlockSpec(shape, lambda i: (0,) * len(shape))

    in_specs = [
        batch_tiled((IMG_PAD,)),               # x
        resident(w1.shape), resident(b1.shape),
        resident(wh.shape), resident(bh.shape),
        resident(w3.shape), resident(b3.shape),
        resident(w4.shape), resident(b4.shape),
        batch_tiled((Z_DIM,)),                 # eps
    ]
    out_shapes = (
        jax.ShapeDtypeStruct((B_pad, IMG_DIM), jnp.float32),    # recon (784 wide)
        jax.ShapeDtypeStruct((B_pad, HEAD_PAD), jnp.float32),   # mu|logvar|pad
    )
    out_specs = [batch_tiled((IMG_DIM,)), batch_tiled((HEAD_PAD,))]

    recon, head = pl.pallas_call(
        _vae_kernel,
        out_shape=out_shapes,
        grid=(num_tiles,),
        in_specs=in_specs,
        out_specs=out_specs,
        compiler_params=pltpu.CompilerParams(
            dimension_semantics=("parallel",)),
    )(x, w1, b1, wh, bh, w3, b3, w4, b4, eps)

    if B_pad != B:                             # row-unpad only when needed
        recon = recon[:B]
        head = head[:B]
    mu = head[:, :Z_DIM]
    logvar = head[:, Z_DIM:2 * Z_DIM]
    return recon, mu, logvar


# -----------------------------------------------------------------------------
# Parameters
# -----------------------------------------------------------------------------
def init_params(key):
    """nn.Linear-style init; weights stored transposed as (in, out), f32."""
    def linear(k, fan_in, fan_out):
        k_w, k_b = jax.random.split(k)
        bound = 1.0 / jnp.sqrt(fan_in)
        w = jax.random.uniform(k_w, (fan_in, fan_out), jnp.float32, -bound, bound)
        b = jax.random.uniform(k_b, (1, fan_out), jnp.float32, -bound, bound)
        return w, b

    ks = jax.random.split(key, 5)
    w1, b1 = linear(ks[0], IMG_DIM, H_DIM)     # fc1:  784 -> 400
    w21, b21 = linear(ks[1], H_DIM, Z_DIM)     # fc21: 400 -> 20
    w22, b22 = linear(ks[2], H_DIM, Z_DIM)     # fc22: 400 -> 20
    w3, b3 = linear(ks[3], Z_DIM, H_DIM)       # fc3:  20  -> 400
    w4, b4 = linear(ks[4], H_DIM, IMG_DIM)     # fc4:  400 -> 784
    return (w1, b1, w21, b21, w22, b22, w3, b3, w4, b4)


def prepare_kernel_params(params):
    """One-time transform: fuse fc21/fc22 into a 128-wide head, pad fc1's
    K dim 784->896, cast weights to bf16 (biases stay f32)."""
    w1, b1, w21, b21, w22, b22, w3, b3, w4, b4 = params
    w1p = jnp.pad(w1, ((0, IMG_PAD - IMG_DIM), (0, 0)))          # (896, 400)

    wh = jnp.zeros((H_DIM, HEAD_PAD), jnp.float32)               # (400, 128)
    wh = wh.at[:, :Z_DIM].set(w21).at[:, Z_DIM:2 * Z_DIM].set(w22)
    bh = jnp.zeros((1, HEAD_PAD), jnp.float32)
    bh = bh.at[:, :Z_DIM].set(b21).at[:, Z_DIM:2 * Z_DIM].set(b22)

    to_bf16 = lambda w: w.astype(jnp.bfloat16)
    return (to_bf16(w1p), b1, to_bf16(wh), bh,
            to_bf16(w3), b3, to_bf16(w4), b4)


# -----------------------------------------------------------------------------
# Pure-JAX reference (same bf16-weight / f32-accumulation math as the kernel)
# -----------------------------------------------------------------------------
def vae_forward_ref(x_nchw, kparams, eps):
    B = x_nchw.shape[0]
    x = x_nchw.reshape(B, IMG_DIM)
    x = jnp.pad(x, ((0, 0), (0, IMG_PAD - IMG_DIM))).astype(jnp.bfloat16)
    w1, b1, wh, bh, w3, b3, w4, b4 = kparams
    h1 = jnp.maximum(jnp.dot(x, w1, preferred_element_type=jnp.float32) + b1, 0.0)
    head = jnp.dot(h1.astype(jnp.bfloat16), wh,
                   preferred_element_type=jnp.float32) + bh
    mu, logvar = head[:, :Z_DIM], head[:, Z_DIM:2 * Z_DIM]
    z = mu + eps * jnp.exp(0.5 * logvar)
    h3 = jnp.maximum(jnp.dot(z.astype(jnp.bfloat16), w3,
                             preferred_element_type=jnp.float32) + b3, 0.0)
    logits = jnp.dot(h3.astype(jnp.bfloat16), w4,
                     preferred_element_type=jnp.float32) + b4
    recon = jax.nn.sigmoid(logits)
    return recon, mu, logvar


def _check(B, k_x, k_eps, kparams):
    x = jax.random.uniform(k_x, (B, 1, 28, 28), jnp.float32)     # NCHW, like MNIST
    # eps ~ N(0,1) replaces torch.randn_like(std); supplied explicitly for
    # determinism.  (Could instead be drawn in-kernel with pltpu.prng_*.)
    eps = jax.random.normal(k_eps, (B, Z_DIM), jnp.float32)

    recon, mu, logvar = vae_forward(x, kparams, eps)
    jax.block_until_ready((recon, mu, logvar))

    r_ref, mu_ref, lv_ref = vae_forward_ref(x, kparams, eps)
    assert recon.shape == (B, IMG_DIM) and mu.shape == (B, Z_DIM) \
        and logvar.shape == (B, Z_DIM)
    assert jnp.allclose(recon, r_ref, atol=1e-2, rtol=1e-2), "recon mismatch"
    assert jnp.allclose(mu, mu_ref, atol=1e-2, rtol=1e-2), "mu mismatch"
    assert jnp.allclose(logvar, lv_ref, atol=1e-2, rtol=1e-2), "logvar mismatch"


if __name__ == "__main__":
    key = jax.random.PRNGKey(0)
    k_param, k_x1, k_e1, k_x2, k_e2 = jax.random.split(key, 5)

    params = init_params(k_param)
    kparams = prepare_kernel_params(params)

    _check(8, k_x1, k_e1, kparams)     # exact tile (no batch padding)
    _check(12, k_x2, k_e2, kparams)    # exercises the batch-padding path

    print("KERNEL_OK")
</pallas_src>

<mosaic_0001>
module attributes {stable_mosaic.version = 11 : i64} {
  func.func @_vae_kernel(%arg0: i32, %arg1: memref<8x896xbf16, #tpu.memory_space<vmem>>, %arg2: memref<896x400xbf16, #tpu.memory_space<vmem>>, %arg3: memref<1x400xf32, #tpu.memory_space<vmem>>, %arg4: memref<400x128xbf16, #tpu.memory_space<vmem>>, %arg5: memref<1x128xf32, #tpu.memory_space<vmem>>, %arg6: memref<20x400xbf16, #tpu.memory_space<vmem>>, %arg7: memref<1x400xf32, #tpu.memory_space<vmem>>, %arg8: memref<400x784xbf16, #tpu.memory_space<vmem>>, %arg9: memref<1x784xf32, #tpu.memory_space<vmem>>, %arg10: memref<8x20xf32, #tpu.memory_space<vmem>>, %arg11: memref<8x784xf32, #tpu.memory_space<vmem>>, %arg12: memref<8x128xf32, #tpu.memory_space<vmem>>) attributes {dimension_semantics = [#tpu.dimension_semantics<parallel>], iteration_bounds = array<i64: 1>, scalar_prefetch = 0 : i64, scratch_operands = 0 : i64, tpu.core_type = #tpu.core_type<tc>, window_params = [{transform_indices = @transform_0, window_bounds = array<i64: 8, 896>}, {pipeline_mode = #tpu.pipeline_mode<synchronous>, transform_indices = @transform_1, window_bounds = array<i64: 896, 400>}, {pipeline_mode = #tpu.pipeline_mode<synchronous>, transform_indices = @transform_2, window_bounds = array<i64: 1, 400>}, {pipeline_mode = #tpu.pipeline_mode<synchronous>, transform_indices = @transform_3, window_bounds = array<i64: 400, 128>}, {pipeline_mode = #tpu.pipeline_mode<synchronous>, transform_indices = @transform_4, window_bounds = array<i64: 1, 128>}, {pipeline_mode = #tpu.pipeline_mode<synchronous>, transform_indices = @transform_5, window_bounds = array<i64: 20, 400>}, {pipeline_mode = #tpu.pipeline_mode<synchronous>, transform_indices = @transform_6, window_bounds = array<i64: 1, 400>}, {pipeline_mode = #tpu.pipeline_mode<synchronous>, transform_indices = @transform_7, window_bounds = array<i64: 400, 784>}, {pipeline_mode = #tpu.pipeline_mode<synchronous>, transform_indices = @transform_8, window_bounds = array<i64: 1, 784>}, {transform_indices = @transform_9, window_bounds = array<i64: 8, 20>}, {transform_indices = @transform_10, window_bounds = array<i64: 8, 784>}, {transform_indices = @transform_11, window_bounds = array<i64: 8, 128>}]} {
    %c0 = arith.constant 0 : index
    %c0_0 = arith.constant 0 : index
    %0 = vector.load %arg1[%c0, %c0_0] : memref<8x896xbf16, #tpu.memory_space<vmem>>, vector<8x896xbf16>
    %c0_1 = arith.constant 0 : index
    %c0_2 = arith.constant 0 : index
    %1 = vector.load %arg2[%c0_1, %c0_2] : memref<896x400xbf16, #tpu.memory_space<vmem>>, vector<896x400xbf16>
    %cst = arith.constant dense<0.000000e+00> : vector<8x400xf32>
    %2 = tpu.matmul %0, %1, %cst {dimension_numbers = #tpu.dot_dimension_numbers<[1], [0], [0], [1], [0, 0, 1, 1], [], []>} : vector<8x896xbf16>, vector<896x400xbf16>, vector<8x400xf32> -> vector<8x400xf32>
    %c0_3 = arith.constant 0 : index
    %c0_4 = arith.constant 0 : index
    %3 = vector.load %arg3[%c0_3, %c0_4] : memref<1x400xf32, #tpu.memory_space<vmem>>, vector<1x400xf32>
    %4 = vector.broadcast %3 : vector<1x400xf32> to vector<8x400xf32>
    %5 = arith.addf %2, %4 : vector<8x400xf32>
    %cst_5 = arith.constant 0.000000e+00 : f32
    %6 = vector.broadcast %cst_5 : f32 to vector<8x400xf32>
    %7 = arith.maximumf %5, %6 : vector<8x400xf32>
    %8 = arith.truncf %7 : vector<8x400xf32> to vector<8x400xbf16>
    %c0_6 = arith.constant 0 : index
    %c0_7 = arith.constant 0 : index
    %9 = vector.load %arg4[%c0_6, %c0_7] : memref<400x128xbf16, #tpu.memory_space<vmem>>, vector<400x128xbf16>
    %cst_8 = arith.constant dense<0.000000e+00> : vector<8x128xf32>
    %10 = tpu.matmul %8, %9, %cst_8 {dimension_numbers = #tpu.dot_dimension_numbers<[1], [0], [0], [1], [0, 0, 1, 1], [], []>} : vector<8x400xbf16>, vector<400x128xbf16>, vector<8x128xf32> -> vector<8x128xf32>
    %c0_9 = arith.constant 0 : index
    %c0_10 = arith.constant 0 : index
    %11 = vector.load %arg5[%c0_9, %c0_10] : memref<1x128xf32, #tpu.memory_space<vmem>>, vector<1x128xf32>
    %12 = vector.broadcast %11 : vector<1x128xf32> to vector<8x128xf32>
    %13 = arith.addf %10, %12 : vector<8x128xf32>
    %14 = vector.extract_strided_slice %13 {offsets = [0, 0], sizes = [8, 20], strides = [1, 1]} : vector<8x128xf32> to vector<8x20xf32>
    %15 = vector.extract_strided_slice %13 {offsets = [0, 20], sizes = [8, 20], strides = [1, 1]} : vector<8x128xf32> to vector<8x20xf32>
    %c0_11 = arith.constant 0 : index
    %c0_12 = arith.constant 0 : index
    %16 = vector.load %arg10[%c0_11, %c0_12] : memref<8x20xf32, #tpu.memory_space<vmem>>, vector<8x20xf32>
    %cst_13 = arith.constant 5.000000e-01 : f32
    %17 = vector.broadcast %cst_13 : f32 to vector<8x20xf32>
    %18 = arith.mulf %17, %15 : vector<8x20xf32>
    %19 = math.exp %18 : vector<8x20xf32>
    %20 = arith.mulf %16, %19 : vector<8x20xf32>
    %21 = arith.addf %14, %20 : vector<8x20xf32>
    %22 = arith.truncf %21 : vector<8x20xf32> to vector<8x20xbf16>
    %c0_14 = arith.constant 0 : index
    %c0_15 = arith.constant 0 : index
    %23 = vector.load %arg6[%c0_14, %c0_15] : memref<20x400xbf16, #tpu.memory_space<vmem>>, vector<20x400xbf16>
    %cst_16 = arith.constant dense<0.000000e+00> : vector<8x400xf32>
    %24 = tpu.matmul %22, %23, %cst_16 {dimension_numbers = #tpu.dot_dimension_numbers<[1], [0], [0], [1], [0, 0, 1, 1], [], []>} : vector<8x20xbf16>, vector<20x400xbf16>, vector<8x400xf32> -> vector<8x400xf32>
    %c0_17 = arith.constant 0 : index
    %c0_18 = arith.constant 0 : index
    %25 = vector.load %arg7[%c0_17, %c0_18] : memref<1x400xf32, #tpu.memory_space<vmem>>, vector<1x400xf32>
    %26 = vector.broadcast %25 : vector<1x400xf32> to vector<8x400xf32>
    %27 = arith.addf %24, %26 : vector<8x400xf32>
    %cst_19 = arith.constant 0.000000e+00 : f32
    %28 = vector.broadcast %cst_19 : f32 to vector<8x400xf32>
    %29 = arith.maximumf %27, %28 : vector<8x400xf32>
    %30 = arith.truncf %29 : vector<8x400xf32> to vector<8x400xbf16>
    %c0_20 = arith.constant 0 : index
    %c0_21 = arith.constant 0 : index
    %31 = vector.load %arg8[%c0_20, %c0_21] : memref<400x784xbf16, #tpu.memory_space<vmem>>, vector<400x784xbf16>
    %cst_22 = arith.constant dense<0.000000e+00> : vector<8x784xf32>
    %32 = tpu.matmul %30, %31, %cst_22 {dimension_numbers = #tpu.dot_dimension_numbers<[1], [0], [0], [1], [0, 0, 1, 1], [], []>} : vector<8x400xbf16>, vector<400x784xbf16>, vector<8x784xf32> -> vector<8x784xf32>
    %c0_23 = arith.constant 0 : index
    %c0_24 = arith.constant 0 : index
    %33 = vector.load %arg9[%c0_23, %c0_24] : memref<1x784xf32, #tpu.memory_space<vmem>>, vector<1x784xf32>
    %34 = vector.broadcast %33 : vector<1x784xf32> to vector<8x784xf32>
    %35 = arith.addf %32, %34 : vector<8x784xf32>
    %36 = arith.negf %35 : vector<8x784xf32>
    %37 = math.exp %36 : vector<8x784xf32>
    %cst_25 = arith.constant 1.000000e+00 : f32
    %38 = vector.broadcast %cst_25 : f32 to vector<8x784xf32>
    %39 = arith.addf %38, %37 : vector<8x784xf32>
    %40 = arith.divf %38, %39 : vector<8x784xf32>
    %c0_26 = arith.constant 0 : index
    %c0_27 = arith.constant 0 : index
    %41 = vector.load %arg11[%c0_26, %c0_27] : memref<8x784xf32, #tpu.memory_space<vmem>>, vector<8x784xf32>
    tpu.vector_store %arg11[%c0_26, %c0_27], %40 {strides = array<i32>} : memref<8x784xf32, #tpu.memory_space<vmem>>, vector<8x784xf32>,
    %c0_28 = arith.constant 0 : index
    %c0_29 = arith.constant 0 : index
    %42 = vector.load %arg12[%c0_28, %c0_29] : memref<8x128xf32, #tpu.memory_space<vmem>>, vector<8x128xf32>
    tpu.vector_store %arg12[%c0_28, %c0_29], %13 {strides = array<i32>} : memref<8x128xf32, #tpu.memory_space<vmem>>, vector<8x128xf32>,
    return
  }
  func.func @transform_0(%arg0: i32) -> (i32, i32) {
    %c0_i32 = arith.constant 0 : i32
    %c0_i32_0 = arith.constant 0 : i32
    return %arg0, %c0_i32 : i32, i32
  }
  func.func @transform_1(%arg0: i32) -> (i32, i32) {
    %c0_i32 = arith.constant 0 : i32
    %c0_i32_0 = arith.constant 0 : i32
    %c0_i32_1 = arith.constant 0 : i32
    return %c0_i32, %c0_i32_0 : i32, i32
  }
  func.func @transform_2(%arg0: i32) -> (i32, i32) {
    %c0_i32 = arith.constant 0 : i32
    %c0_i32_0 = arith.constant 0 : i32
    %c0_i32_1 = arith.constant 0 : i32
    return %c0_i32, %c0_i32_0 : i32, i32
  }
  func.func @transform_3(%arg0: i32) -> (i32, i32) {
    %c0_i32 = arith.constant 0 : i32
    %c0_i32_0 = arith.constant 0 : i32
    %c0_i32_1 = arith.constant 0 : i32
    return %c0_i32, %c0_i32_0 : i32, i32
  }
  func.func @transform_4(%arg0: i32) -> (i32, i32) {
    %c0_i32 = arith.constant 0 : i32
    %c0_i32_0 = arith.constant 0 : i32
    %c0_i32_1 = arith.constant 0 : i32
    return %c0_i32, %c0_i32_0 : i32, i32
  }
  func.func @transform_5(%arg0: i32) -> (i32, i32) {
    %c0_i32 = arith.constant 0 : i32
    %c0_i32_0 = arith.constant 0 : i32
    %c0_i32_1 = arith.constant 0 : i32
    return %c0_i32, %c0_i32_0 : i32, i32
  }
  func.func @transform_6(%arg0: i32) -> (i32, i32) {
    %c0_i32 = arith.constant 0 : i32
    %c0_i32_0 = arith.constant 0 : i32
    %c0_i32_1 = arith.constant 0 : i32
    return %c0_i32, %c0_i32_0 : i32, i32
  }
  func.func @transform_7(%arg0: i32) -> (i32, i32) {
    %c0_i32 = arith.constant 0 : i32
    %c0_i32_0 = arith.constant 0 : i32
    %c0_i32_1 = arith.constant 0 : i32
    return %c0_i32, %c0_i32_0 : i32, i32
  }
  func.func @transform_8(%arg0: i32) -> (i32, i32) {
    %c0_i32 = arith.constant 0 : i32
    %c0_i32_0 = arith.constant 0 : i32
    %c0_i32_1 = arith.constant 0 : i32
    return %c0_i32, %c0_i32_0 : i32, i32
  }
  func.func @transform_9(%arg0: i32) -> (i32, i32) {
    %c0_i32 = arith.constant 0 : i32
    %c0_i32_0 = arith.constant 0 : i32
    return %arg0, %c0_i32 : i32, i32
  }
  func.func @transform_10(%arg0: i32) -> (i32, i32) {
    %c0_i32 = arith.constant 0 : i32
    %c0_i32_0 = arith.constant 0 : i32
    return %arg0, %c0_i32 : i32, i32
  }
  func.func @transform_11(%arg0: i32) -> (i32, i32) {
    %c0_i32 = arith.constant 0 : i32
    %c0_i32_0 = arith.constant 0 : i32
    return %arg0, %c0_i32 : i32, i32
  }
}

</mosaic_0001>

<bundles_post_ra>
// kernel: tpu_custom_call.1
= control target key start
LH: loop header
LB: loop body
LE: loop exit
PB: predicated region body
PF: predicated region fallthrough
CT: control target
= control target key end

     0   :  { %17 = vsyncpa [#allocation3], 0  ;;  %s6563_s0 = inlined_call_operand.vmem [shape: bf16[8,896], index: 0, kind: input, shape index: {}]   ;;  %s6564_s1 = inlined_call_operand.vmem [shape: bf16[896,400], index: 1, kind: input, shape index: {}]   ;;  %s6565_s2 = inlined_call_operand.vmem [shape: f32[1,400], index: 2, kind: input, shape index: {}]   ;;  %s6566_s3 = inlined_call_operand.vmem [shape: bf16[400,128], index: 3, kind: input, shape index: {}]   ;;  %s6567_s4 = inlined_call_operand.vmem [shape: f32[1,128], index: 4, kind: input, shape index: {}]   ;;  %s6568_s5 = inlined_call_operand.vmem [shape: bf16[20,400], index: 5, kind: input, shape index: {}]   ;;  %s6569_s6 = inlined_call_operand.vmem [shape: f32[1,400], index: 6, kind: input, shape index: {}]   ;;  %s6570_s7 = inlined_call_operand.vmem [shape: bf16[400,784], index: 7, kind: input, shape index: {}]   ;;  %s6571_s8 = inlined_call_operand.vmem [shape: f32[1,784], index: 8, kind: input, shape index: {}]   ;;  %s6572_s9 = inlined_call_operand.vmem [shape: f32[8,20], index: 9, kind: input, shape index: {}]   ;;  %s6573_s10 = inlined_call_operand.hbm [shape: f32[8,784], index: 10, kind: output, shape index: {0}]   ;;  %s6574_s11 = inlined_call_operand.hbm [shape: f32[8,128], index: 11, kind: output, shape index: {1}]  }
   0x1   :  { %v4332_v0 = vld [vmem:[%s6564_s1 + $0x4] ss:$16 sps:$4 sm:$0xff]   ;;  %v4334_v1 = vld [vmem:[%s6564_s1 + $0xc] ss:$16 sps:$4 sm:$0xff]   ;;  %v4336_v2 = vld [vmem:[%s6564_s1] ss:$16 sps:$4 sm:$0xff]  }
   0x2   :  { %1435 = vmatprep.subr.bf16.mxu0 %v4332_v0  ;;  %v4337_v3 = vld [vmem:[%s6564_s1 + $0x8] ss:$16 sps:$4 sm:$0xff]   ;;  %1599 = vmatprep.subr.bf16.mxu1 %v4334_v1  ;;  %v4338_v4 = vld [vmem:[%s6564_s1 + $0x24] ss:$16 sps:$4 sm:$0xff]   ;;  %v4340_v5 = vld [vmem:[%s6564_s1 + $0x2c] ss:$16 sps:$4 sm:$0xff]  }
   0x3   :  { %1436 = vmatpush1.bf16.msra.mxu0 %v4336_v2  ;;  %1600 = vmatpush1.bf16.msra.mxu1 %v4337_v3  ;;  %v4342_v6 = vld [vmem:[%s6564_s1 + $0x20] ss:$16 sps:$4 sm:$0xff]   ;;  %v4343_v7 = vld [vmem:[%s6564_s1 + $0x28] ss:$16 sps:$4 sm:$0xff]   ;;  %v4344_v8 = vld [vmem:[%s6564_s1 + $0x44] ss:$16 sps:$4 sm:$0xff]  }
   0x4   :  { %1437 = vmatprep.subr.bf16.mxu0 %v4338_v4  ;;  %1601 = vmatprep.subr.bf16.mxu1 %v4340_v5  ;;  %v4346_v9 = vld [vmem:[%s6564_s1 + $0x4c] ss:$16 sps:$4 sm:$0xff]   ;;  %v4348_v10 = vld [vmem:[%s6564_s1 + $0x40] ss:$16 sps:$4 sm:$0xff]   ;;  %v4349_v11 = vld [vmem:[%s6564_s1 + $0x48] ss:$16 sps:$4 sm:$0xff]  }
   0x5   :  { %v4350_v12 = vld [vmem:[%s6564_s1 + $0x64] ss:$16 sps:$4 sm:$0xff]   ;;  %v4352_v13 = vld [vmem:[%s6564_s1 + $0x6c] ss:$16 sps:$4 sm:$0xff]   ;;  %v4354_v14 = vld [vmem:[%s6564_s1 + $0x60] ss:$16 sps:$4 sm:$0xff]  }
   0x6   :  { %v4355_v15 = vld [vmem:[%s6564_s1 + $0x68] ss:$16 sps:$4 sm:$0xff]   ;;  %v4356_v16 = vld [vmem:[%s6564_s1 + $0x84] ss:$16 sps:$4 sm:$0xff]   ;;  %v4358_v17 = vld [vmem:[%s6564_s1 + $0x8c] ss:$16 sps:$4 sm:$0xff]  }
   0x7   :  { %1438 = vmatpush1.bf16.msra.mxu0 %v4342_v6  ;;  %1602 = vmatpush1.bf16.msra.mxu1 %v4343_v7  ;;  %v4360_v18 = vld [vmem:[%s6564_s1 + $0x80] ss:$16 sps:$4 sm:$0xff]   ;;  %v4361_v19 = vld [vmem:[%s6564_s1 + $0x88] ss:$16 sps:$4 sm:$0xff]   ;;  %v4362_v20 = vld [vmem:[%s6564_s1 + $0xa4] ss:$16 sps:$4 sm:$0xff]  }
   0x8   :  { %1439 = vmatprep.subr.bf16.mxu0 %v4344_v8  ;;  %1603 = vmatprep.subr.bf16.mxu1 %v4346_v9  ;;  %v4364_v21 = vld [vmem:[%s6564_s1 + $0xac] ss:$16 sps:$4 sm:$0xff]   ;;  %v4366_v22 = vld [vmem:[%s6564_s1 + $0xa0] ss:$16 sps:$4 sm:$0xff]   ;;  %v4367_v23 = vld [vmem:[%s6564_s1 + $0xa8] ss:$16 sps:$4 sm:$0xff]  }
   0x9   :  { %v4368_v24 = vld [vmem:[%s6564_s1 + $0xc4] ss:$16 sps:$4 sm:$0xff]   ;;  %v4370_v25 = vld [vmem:[%s6564_s1 + $0xcc] ss:$16 sps:$4 sm:$0xff]   ;;  %v4372_v26 = vld [vmem:[%s6564_s1 + $0xc0] ss:$16 sps:$4 sm:$0xff]  }
   0xa   :  { %v4373_v27 = vld [vmem:[%s6564_s1 + $0xc8] ss:$16 sps:$4 sm:$0xff]   ;;  %v4374_v28 = vld [vmem:[%s6564_s1 + $0xe4] ss:$16 sps:$4 sm:$0xff]   ;;  %v4376_v29 = vld [vmem:[%s6564_s1 + $0xec] ss:$16 sps:$4 sm:$0xff]  }
   0xb   :  { %1440 = vmatpush1.bf16.msra.mxu0 %v4348_v10  ;;  %1604 = vmatpush1.bf16.msra.mxu1 %v4349_v11  ;;  %v4378_v30 = vld [vmem:[%s6564_s1 + $0xe0] ss:$16 sps:$4 sm:$0xff]   ;;  %v4379_v31 = vld [vmem:[%s6564_s1 + $0xe8] ss:$16 sps:$4 sm:$0xff]   ;;  %v4380_v32 = vld [vmem:[%s6564_s1 + $0x104] ss:$16 sps:$4 sm:$0xff]  }
   0xc   :  { %1441 = vmatprep.subr.bf16.mxu0 %v4350_v12  ;;  %1605 = vmatprep.subr.bf16.mxu1 %v4352_v13  ;;  %v4382_v33 = vld [vmem:[%s6564_s1 + $0x10c] ss:$16 sps:$4 sm:$0xff]   ;;  %v4384_v34 = vld [vmem:[%s6564_s1 + $0x100] ss:$16 sps:$4 sm:$0xff]   ;;  %v4385_v35 = vld [vmem:[%s6564_s1 + $0x108] ss:$16 sps:$4 sm:$0xff]  }
   0xd   :  { %v4386_v36 = vld [vmem:[%s6564_s1 + $0x124] ss:$16 sps:$4 sm:$0xff]   ;;  %v4388_v37 = vld [vmem:[%s6564_s1 + $0x12c] ss:$16 sps:$4 sm:$0xff]   ;;  %v4390_v38 = vld [vmem:[%s6564_s1 + $0x120] ss:$16 sps:$4 sm:$0xff]  }
   0xe   :  { %v4391_v39 = vld [vmem:[%s6564_s1 + $0x128] ss:$16 sps:$4 sm:$0xff]   ;;  %v4392_v40 = vld [vmem:[%s6564_s1 + $0x144] ss:$16 sps:$4 sm:$0xff]   ;;  %v4394_v41 = vld [vmem:[%s6564_s1 + $0x14c] ss:$16 sps:$4 sm:$0xff]  }
   0xf   :  { %1442 = vmatpush1.bf16.msra.mxu0 %v4354_v14  ;;  %1606 = vmatpush1.bf16.msra.mxu1 %v4355_v15  ;;  %v4396_v42 = vld [vmem:[%s6564_s1 + $0x140] ss:$16 sps:$4 sm:$0xff]   ;;  %v4397_v43 = vld [vmem:[%s6564_s1 + $0x148] ss:$16 sps:$4 sm:$0xff]   ;;  %v4398_v44 = vld [vmem:[%s6564_s1 + $0x164] ss:$16 sps:$4 sm:$0xff]  }
  0x10   :  { %1443 = vmatprep.subr.bf16.mxu0 %v4356_v16  ;;  %1607 = vmatprep.subr.bf16.mxu1 %v4358_v17  ;;  %v4400_v45 = vld [vmem:[%s6564_s1 + $0x16c] ss:$16 sps:$4 sm:$0xff]   ;;  %v40_v46 = vld [vmem:[%s6563_s0] sm:$0xff]  ;;  %v4403_v49 = vld [vmem:[%s6564_s1 + $0x168] ss:$16 sps:$4 sm:$0xff]  }
  0x11   :  { %v4402_v47 = vld [vmem:[%s6564_s1 + $0x160] ss:$16 sps:$4 sm:$0xff]   ;;  %v3783_v48 = vcombine.high %v40_v46, %v40_v46  ;;  %v4404_v50 = vld [vmem:[%s6564_s1 + $0x184] ss:$16 sps:$4 sm:$0xff]   ;;  %v4406_v51 = vld [vmem:[%s6564_s1 + $0x18c] ss:$16 sps:$4 sm:$0xff]   ;;  %v3782_v4 = vcombine.low %v40_v46, %v40_v46 }
  0x12   :  { %v4408_v52 = vld [vmem:[%s6564_s1 + $0x180] ss:$16 sps:$4 sm:$0xff]   ;;  %v4409_v53 = vld [vmem:[%s6564_s1 + $0x188] ss:$16 sps:$4 sm:$0xff]   ;;  %v4410_v54 = vld [vmem:[%s6564_s1 + $0x1a4] ss:$16 sps:$4 sm:$0xff]  }
  0x13   :  { %1444 = vmatpush1.bf16.msra.mxu0 %v4360_v18  ;;  %1608 = vmatpush1.bf16.msra.mxu1 %v4361_v19  ;;  %v4412_v55 = vld [vmem:[%s6564_s1 + $0x1ac] ss:$16 sps:$4 sm:$0xff]   ;;  %v4414_v56 = vld [vmem:[%s6564_s1 + $0x1a0] ss:$16 sps:$4 sm:$0xff]   ;;  %v4415_v57 = vld [vmem:[%s6564_s1 + $0x1a8] ss:$16 sps:$4 sm:$0xff]  }
  0x14   :  { %1445 = vmatprep.subr.bf16.mxu0 %v4362_v20  ;;  %1609 = vmatprep.subr.bf16.mxu1 %v4364_v21  ;;  %v4416_v58 = vld [vmem:[%s6564_s1 + $0x1c4] ss:$16 sps:$4 sm:$0xff]   ;;  %v4418_v59 = vld [vmem:[%s6564_s1 + $0x1cc] ss:$16 sps:$4 sm:$0xff]   ;;  %v4420_v60 = vld [vmem:[%s6564_s1 + $0x1c0] ss:$16 sps:$4 sm:$0xff]  }
  0x15   :  { %1467 = vmatprep.mubr.bf16.mxu0 %v3783_v48  ;;  %1631 = vmatprep.mubr.bf16.mxu1 %v3783_v48  ;;  %v4421_v61 = vld [vmem:[%s6564_s1 + $0x1c8] ss:$16 sps:$4 sm:$0xff]   ;;  %v4422_v62 = vld [vmem:[%s6564_s1 + $0x1e4] ss:$16 sps:$4 sm:$0xff]   ;;  %v4424_v63 = vld [vmem:[%s6564_s1 + $0x1ec] ss:$16 sps:$4 sm:$0xff]  }
  0x16   :  { %v4426_v0 = vld [vmem:[%s6564_s1 + $0x1e0] ss:$16 sps:$4 sm:$0xff]   ;;  %v4427_v1 = vld [vmem:[%s6564_s1 + $0x1e8] ss:$16 sps:$4 sm:$0xff]   ;;  %v4432_v2 = vld [vmem:[%s6564_s1 + $0x204] ss:$16 sps:$4 sm:$0xff]  }
  0x17   :  { %1446 = vmatpush1.bf16.msra.mxu0 %v4366_v22  ;;  %1610 = vmatpush1.bf16.msra.mxu1 %v4367_v23  ;;  %v4435_v3 = vld [vmem:[%s6564_s1 + $0x20c] ss:$16 sps:$4 sm:$0xff]   ;;  %v4430_v5 = vld [vmem:[%s6564_s1 + $0x200] ss:$16 sps:$4 sm:$0xff]   ;;  %v4433_v6 = vld [vmem:[%s6564_s1 + $0x208] ss:$16 sps:$4 sm:$0xff]  }
  0x18   :  { %1447 = vmatprep.subr.bf16.mxu0 %v4368_v24  ;;  %1611 = vmatprep.subr.bf16.mxu1 %v4370_v25  ;;  %v4438_v7 = vld [vmem:[%s6564_s1 + $0x224] ss:$16 sps:$4 sm:$0xff]   ;;  %v4441_v8 = vld [vmem:[%s6564_s1 + $0x22c] ss:$16 sps:$4 sm:$0xff]   ;;  %v4436_v9 = vld [vmem:[%s6564_s1 + $0x220] ss:$16 sps:$4 sm:$0xff]  }
  0x19   :  { %v4439_v10 = vld [vmem:[%s6564_s1 + $0x228] ss:$16 sps:$4 sm:$0xff]   ;;  %v4444_v11 = vld [vmem:[%s6564_s1 + $0x244] ss:$16 sps:$4 sm:$0xff]   ;;  %v4447_v12 = vld [vmem:[%s6564_s1 + $0x24c] ss:$16 sps:$4 sm:$0xff]  }
  0x1a   :  { %v4442_v13 = vld [vmem:[%s6564_s1 + $0x240] ss:$16 sps:$4 sm:$0xff]   ;;  %v4445_v14 = vld [vmem:[%s6564_s1 + $0x248] ss:$16 sps:$4 sm:$0xff]   ;;  %v4450_v15 = vld [vmem:[%s6564_s1 + $0x264] ss:$16 sps:$4 sm:$0xff]  }
  0x1b   :  { %1448 = vmatpush1.bf16.msra.mxu0 %v4372_v26  ;;  %1612 = vmatpush1.bf16.msra.mxu1 %v4373_v27  ;;  %v4453_v16 = vld [vmem:[%s6564_s1 + $0x26c] ss:$16 sps:$4 sm:$0xff]   ;;  %v4448_v17 = vld [vmem:[%s6564_s1 + $0x260] ss:$16 sps:$4 sm:$0xff]   ;;  %v4451_v18 = vld [vmem:[%s6564_s1 + $0x268] ss:$16 sps:$4 sm:$0xff]  }
  0x1c   :  { %1449 = vmatprep.subr.bf16.mxu0 %v4374_v28  ;;  %1613 = vmatprep.subr.bf16.mxu1 %v4376_v29  ;;  %v4456_v19 = vld [vmem:[%s6564_s1 + $0x284] ss:$16 sps:$4 sm:$0xff]   ;;  %v4459_v20 = vld [vmem:[%s6564_s1 + $0x28c] ss:$16 sps:$4 sm:$0xff]   ;;  %v4454_v21 = vld [vmem:[%s6564_s1 + $0x280] ss:$16 sps:$4 sm:$0xff]  }
  0x1d   :  { %v4457_v22 = vld [vmem:[%s6564_s1 + $0x288] ss:$16 sps:$4 sm:$0xff]   ;;  %v4462_v23 = vld [vmem:[%s6564_s1 + $0x2a4] ss:$16 sps:$4 sm:$0xff]   ;;  %v4465_v24 = vld [vmem:[%s6564_s1 + $0x2ac] ss:$16 sps:$4 sm:$0xff]  }
  0x1e   :  { %v4460_v25 = vld [vmem:[%s6564_s1 + $0x2a0] ss:$16 sps:$4 sm:$0xff]   ;;  %v4463_v26 = vld [vmem:[%s6564_s1 + $0x2a8] ss:$16 sps:$4 sm:$0xff]   ;;  %v4468_v27 = vld [vmem:[%s6564_s1 + $0x2c4] ss:$16 sps:$4 sm:$0xff]  }
  0x1f   :  { %1450 = vmatpush1.bf16.msra.mxu0 %v4378_v30  ;;  %1614 = vmatpush1.bf16.msra.mxu1 %v4379_v31  ;;  %v4471_v28 = vld [vmem:[%s6564_s1 + $0x2cc] ss:$16 sps:$4 sm:$0xff]   ;;  %v4466_v31 = vld [vmem:[%s6564_s1 + $0x2c0] ss:$16 sps:$4 sm:$0xff]   ;;  %v4493_v48 = vld [vmem:[%s6564_s1 + $0x348] ss:$16 sps:$4 sm:$0xff]  }
  0x20   :  { %1451 = vmatprep.subr.bf16.mxu0 %v4380_v32  ;;  %1615 = vmatprep.subr.bf16.mxu1 %v4382_v33  ;;  %v5378_v29 = vld [vmem:[%s6563_s0 + $0x8] sm:$0xff]  ;;  %v4474_v33 = vld [vmem:[%s6564_s1 + $0x2e4] ss:$16 sps:$4 sm:$0xff]  }
  0x21   :  { %v3785_v30 = vcombine.high %v5378_v29, %v5378_v29  ;;  %v4469_v32 = vld [vmem:[%s6564_s1 + $0x2c8] ss:$16 sps:$4 sm:$0xff]   ;;  %v4495_v46 = vld [vmem:[%s6564_s1 + $0x34c] ss:$16 sps:$4 sm:$0xff]  }
  0x23   :  { %1452 = vmatpush1.bf16.msra.mxu0 %v4384_v34  ;;  %1616 = vmatpush1.bf16.msra.mxu1 %v4385_v35  ;;  %v4477_v34 = vld [vmem:[%s6564_s1 + $0x2ec] ss:$16 sps:$4 sm:$0xff]   ;;  %v4472_v35 = vld [vmem:[%s6564_s1 + $0x2e0] ss:$16 sps:$4 sm:$0xff]  }
  0x24   :  { %1453 = vmatprep.subr.bf16.mxu0 %v4386_v36  ;;  %1617 = vmatprep.subr.bf16.mxu1 %v4388_v37  ;;  %v4475_v36 = vld [vmem:[%s6564_s1 + $0x2e8] ss:$16 sps:$4 sm:$0xff]   ;;  %v4480_v37 = vld [vmem:[%s6564_s1 + $0x304] ss:$16 sps:$4 sm:$0xff]  }
  0x27   :  { %1454 = vmatpush1.bf16.msra.mxu0 %v4390_v38  ;;  %1618 = vmatpush1.bf16.msra.mxu1 %v4391_v39  ;;  %v4483_v38 = vld [vmem:[%s6564_s1 + $0x30c] ss:$16 sps:$4 sm:$0xff]   ;;  %v4478_v39 = vld [vmem:[%s6564_s1 + $0x300] ss:$16 sps:$4 sm:$0xff]  }
  0x28   :  { %1455 = vmatprep.subr.bf16.mxu0 %v4392_v40  ;;  %1619 = vmatprep.subr.bf16.mxu1 %v4394_v41  ;;  %v4481_v40 = vld [vmem:[%s6564_s1 + $0x308] ss:$16 sps:$4 sm:$0xff]   ;;  %v4486_v41 = vld [vmem:[%s6564_s1 + $0x324] ss:$16 sps:$4 sm:$0xff]  }
  0x2b   :  { %1456 = vmatpush1.bf16.msra.mxu0 %v4396_v42  ;;  %1620 = vmatpush1.bf16.msra.mxu1 %v4397_v43  ;;  %v4489_v42 = vld [vmem:[%s6564_s1 + $0x32c] ss:$16 sps:$4 sm:$0xff]   ;;  %v4484_v43 = vld [vmem:[%s6564_s1 + $0x320] ss:$16 sps:$4 sm:$0xff]  }
  0x2c   :  { %1457 = vmatprep.subr.bf16.mxu0 %v4398_v44  ;;  %1621 = vmatprep.subr.bf16.mxu1 %v4400_v45  ;;  %v4487_v44 = vld [vmem:[%s6564_s1 + $0x328] ss:$16 sps:$4 sm:$0xff]   ;;  %v4492_v45 = vld [vmem:[%s6564_s1 + $0x344] ss:$16 sps:$4 sm:$0xff]  }
  0x2f   :  { %1458 = vmatpush1.bf16.msra.mxu0 %v4402_v47  ;;  %1622 = vmatpush1.bf16.msra.mxu1 %v4403_v49  ;;  %v4490_v47 = vld [vmem:[%s6564_s1 + $0x340] ss:$16 sps:$4 sm:$0xff]   ;;  %v4498_v49 = vld [vmem:[%s6564_s1 + $0x364] ss:$16 sps:$4 sm:$0xff]  }
  0x30   :  { %1459 = vmatprep.subr.bf16.mxu0 %v4404_v50  ;;  %1623 = vmatprep.subr.bf16.mxu1 %v4406_v51  ;;  %v4501_v50 = vld [vmem:[%s6564_s1 + $0x36c] ss:$16 sps:$4 sm:$0xff]   ;;  %v4496_v51 = vld [vmem:[%s6564_s1 + $0x360] ss:$16 sps:$4 sm:$0xff]  }
  0x33   :  { %1460 = vmatpush1.bf16.msra.mxu0 %v4408_v52  ;;  %1624 = vmatpush1.bf16.msra.mxu1 %v4409_v53  ;;  %v4499_v52 = vld [vmem:[%s6564_s1 + $0x368] ss:$16 sps:$4 sm:$0xff]   ;;  %v4504_v53 = vld [vmem:[%s6564_s1 + $0x384] ss:$16 sps:$4 sm:$0xff]  }
  0x34   :  { %1461 = vmatprep.subr.bf16.mxu0 %v4410_v54  ;;  %1625 = vmatprep.subr.bf16.mxu1 %v4412_v55  ;;  %v4507_v54 = vld [vmem:[%s6564_s1 + $0x38c] ss:$16 sps:$4 sm:$0xff]   ;;  %v4502_v55 = vld [vmem:[%s6564_s1 + $0x380] ss:$16 sps:$4 sm:$0xff]  }
  0x37   :  { %1462 = vmatpush1.bf16.msra.mxu0 %v4414_v56  ;;  %1626 = vmatpush1.bf16.msra.mxu1 %v4415_v57  ;;  %v4505_v56 = vld [vmem:[%s6564_s1 + $0x388] ss:$16 sps:$4 sm:$0xff]   ;;  %v4510_v57 = vld [vmem:[%s6564_s1 + $0x3a4] ss:$16 sps:$4 sm:$0xff]  }
  0x38   :  { %1463 = vmatprep.subr.bf16.mxu0 %v4416_v58  ;;  %1627 = vmatprep.subr.bf16.mxu1 %v4418_v59  ;;  %v4513_v58 = vld [vmem:[%s6564_s1 + $0x3ac] ss:$16 sps:$4 sm:$0xff]   ;;  %v4508_v59 = vld [vmem:[%s6564_s1 + $0x3a0] ss:$16 sps:$4 sm:$0xff]  }
  0x3b   :  { %1464 = vmatpush1.bf16.msra.mxu0 %v4420_v60  ;;  %1628 = vmatpush1.bf16.msra.mxu1 %v4421_v61  ;;  %v4511_v60 = vld [vmem:[%s6564_s1 + $0x3a8] ss:$16 sps:$4 sm:$0xff]   ;;  %v4516_v61 = vld [vmem:[%s6564_s1 + $0x3c4] ss:$16 sps:$4 sm:$0xff]  }
  0x3c   :  { %1465 = vmatprep.subr.bf16.mxu0 %v4422_v62  ;;  %1629 = vmatprep.subr.bf16.mxu1 %v4424_v63  ;;  %v4519_v62 = vld [vmem:[%s6564_s1 + $0x3cc] ss:$16 sps:$4 sm:$0xff]   ;;  %v4514_v63 = vld [vmem:[%s6564_s1 + $0x3c0] ss:$16 sps:$4 sm:$0xff]  }
  0x3f   :  { %1466 = vmatpush1.bf16.msra.mxu0 %v4426_v0  ;;  %1630 = vmatpush1.bf16.msra.mxu1 %v4427_v1  ;;  %v4517_v0 = vld [vmem:[%s6564_s1 + $0x3c8] ss:$16 sps:$4 sm:$0xff]   ;;  %v4522_v1 = vld [vmem:[%s6564_s1 + $0x3e4] ss:$16 sps:$4 sm:$0xff]  }
  0x40   :  { %1476 = vmatprep.subr.bf16.mxu0 %v4432_v2  ;;  %1640 = vmatprep.subr.bf16.mxu1 %v4435_v3  ;;  %v4525_v2 = vld [vmem:[%s6564_s1 + $0x3ec] ss:$16 sps:$4 sm:$0xff]   ;;  %v4520_v3 = vld [vmem:[%s6564_s1 + $0x3e0] ss:$16 sps:$4 sm:$0xff]  }
  0x42   :  { %1468 = vmatmul.mubr.bf16.vlgmr.msra.gmra.mrb[0].mxu0 %v3782_v4  ;;  %1632 = vmatmul.mubr.bf16.vlgmr.msra.gmra.mrb[0].mxu1 %v3782_v4  ;;  %v4523_v4 = vld [vmem:[%s6564_s1 + $0x3e8] ss:$16 sps:$4 sm:$0xff]  }
  0x43   :  { %1477 = vmatpush1.bf16.msra.mxu0 %v4430_v5  ;;  %1641 = vmatpush1.bf16.msra.mxu1 %v4433_v6  ;;  %v4530_v5 = vld [vmem:[%s6564_s1 + $0x404] ss:$16 sps:$4 sm:$0xff]   ;;  %v4533_v6 = vld [vmem:[%s6564_s1 + $0x40c] ss:$16 sps:$4 sm:$0xff]  }
  0x44   :  { %1478 = vmatprep.subr.bf16.mxu0 %v4438_v7  ;;  %1642 = vmatprep.subr.bf16.mxu1 %v4441_v8  ;;  %v3784_v7 = vcombine.low %v5378_v29, %v5378_v29  ;;  %v4528_v8 = vld [vmem:[%s6564_s1 + $0x400] ss:$16 sps:$4 sm:$0xff]   ;;  %v4563_v29 = vld [vmem:[%s6564_s1 + $0x4ac] ss:$16 sps:$4 sm:$0xff]  }
  0x45   :  { %1508 = vmatprep.mubr.bf16.mxu0 %v3785_v30  ;;  %1672 = vmatprep.mubr.bf16.mxu1 %v3785_v30  ;;  %v4558_v30 = vld [vmem:[%s6564_s1 + $0x4a0] ss:$16 sps:$4 sm:$0xff]  }
  0x47   :  { %1479 = vmatpush1.bf16.msra.mxu0 %v4436_v9  ;;  %1643 = vmatpush1.bf16.msra.mxu1 %v4439_v10  ;;  %v4531_v9 = vld [vmem:[%s6564_s1 + $0x408] ss:$16 sps:$4 sm:$0xff]   ;;  %v4536_v10 = vld [vmem:[%s6564_s1 + $0x424] ss:$16 sps:$4 sm:$0xff]  }
  0x48   :  { %1480 = vmatprep.subr.bf16.mxu0 %v4444_v11  ;;  %1644 = vmatprep.subr.bf16.mxu1 %v4447_v12  ;;  %v5516_v11 = vld [vmem:[%s6563_s0 + $0x10] sm:$0xff]  ;;  %v4539_v12 = vld [vmem:[%s6564_s1 + $0x42c] ss:$16 sps:$4 sm:$0xff]  }
  0x4b   :  { %1481 = vmatpush1.bf16.msra.mxu0 %v4442_v13  ;;  %1645 = vmatpush1.bf16.msra.mxu1 %v4445_v14  ;;  %v3787_v13 = vcombine.high %v5516_v11, %v5516_v11  ;;  %v4534_v14 = vld [vmem:[%s6564_s1 + $0x420] ss:$16 sps:$4 sm:$0xff]  }
  0x4c   :  { %1482 = vmatprep.subr.bf16.mxu0 %v4450_v15  ;;  %1646 = vmatprep.subr.bf16.mxu1 %v4453_v16  ;;  %v4537_v15 = vld [vmem:[%s6564_s1 + $0x428] ss:$16 sps:$4 sm:$0xff]   ;;  %v4542_v16 = vld [vmem:[%s6564_s1 + $0x444] ss:$16 sps:$4 sm:$0xff]  }
  0x4f   :  { %1483 = vmatpush1.bf16.msra.mxu0 %v4448_v17  ;;  %1647 = vmatpush1.bf16.msra.mxu1 %v4451_v18  ;;  %v4545_v17 = vld [vmem:[%s6564_s1 + $0x44c] ss:$16 sps:$4 sm:$0xff]   ;;  %v4540_v18 = vld [vmem:[%s6564_s1 + $0x440] ss:$16 sps:$4 sm:$0xff]  }
  0x50   :  { %1484 = vmatprep.subr.bf16.mxu0 %v4456_v19  ;;  %1648 = vmatprep.subr.bf16.mxu1 %v4459_v20  ;;  %v4543_v19 = vld [vmem:[%s6564_s1 + $0x448] ss:$16 sps:$4 sm:$0xff]   ;;  %v4548_v20 = vld [vmem:[%s6564_s1 + $0x464] ss:$16 sps:$4 sm:$0xff]  }
  0x53   :  { %1485 = vmatpush1.bf16.msra.mxu0 %v4454_v21  ;;  %1649 = vmatpush1.bf16.msra.mxu1 %v4457_v22  ;;  %v4551_v21 = vld [vmem:[%s6564_s1 + $0x46c] ss:$16 sps:$4 sm:$0xff]   ;;  %v4546_v22 = vld [vmem:[%s6564_s1 + $0x460] ss:$16 sps:$4 sm:$0xff]  }
  0x54   :  { %1486 = vmatprep.subr.bf16.mxu0 %v4462_v23  ;;  %1650 = vmatprep.subr.bf16.mxu1 %v4465_v24  ;;  %v4549_v23 = vld [vmem:[%s6564_s1 + $0x468] ss:$16 sps:$4 sm:$0xff]   ;;  %v4554_v24 = vld [vmem:[%s6564_s1 + $0x484] ss:$16 sps:$4 sm:$0xff]  }
  0x57   :  { %1487 = vmatpush1.bf16.msra.mxu0 %v4460_v25  ;;  %1651 = vmatpush1.bf16.msra.mxu1 %v4463_v26  ;;  %v4557_v25 = vld [vmem:[%s6564_s1 + $0x48c] ss:$16 sps:$4 sm:$0xff]   ;;  %v4552_v26 = vld [vmem:[%s6564_s1 + $0x480] ss:$16 sps:$4 sm:$0xff]  }
  0x58   :  { %1488 = vmatprep.subr.bf16.mxu0 %v4468_v27  ;;  %1652 = vmatprep.subr.bf16.mxu1 %v4471_v28  ;;  %v4555_v27 = vld [vmem:[%s6564_s1 + $0x488] ss:$16 sps:$4 sm:$0xff]   ;;  %v4560_v28 = vld [vmem:[%s6564_s1 + $0x4a4] ss:$16 sps:$4 sm:$0xff]  }
  0x5b   :  { %1489 = vmatpush1.bf16.msra.mxu0 %v4466_v31  ;;  %1653 = vmatpush1.bf16.msra.mxu1 %v4469_v32  ;;  %v4561_v31 = vld [vmem:[%s6564_s1 + $0x4a8] ss:$16 sps:$4 sm:$0xff]   ;;  %v4566_v32 = vld [vmem:[%s6564_s1 + $0x4c4] ss:$16 sps:$4 sm:$0xff]  }
  0x5c   :  { %1490 = vmatprep.subr.bf16.mxu0 %v4474_v33  ;;  %1654 = vmatprep.subr.bf16.mxu1 %v4477_v34  ;;  %v4569_v33 = vld [vmem:[%s6564_s1 + $0x4cc] ss:$16 sps:$4 sm:$0xff]   ;;  %v4564_v34 = vld [vmem:[%s6564_s1 + $0x4c0] ss:$16 sps:$4 sm:$0xff]  }
  0x5f   :  { %1491 = vmatpush1.bf16.msra.mxu0 %v4472_v35  ;;  %1655 = vmatpush1.bf16.msra.mxu1 %v4475_v36  ;;  %v4567_v35 = vld [vmem:[%s6564_s1 + $0x4c8] ss:$16 sps:$4 sm:$0xff]   ;;  %v4572_v36 = vld [vmem:[%s6564_s1 + $0x4e4] ss:$16 sps:$4 sm:$0xff]  }
  0x60   :  { %1492 = vmatprep.subr.bf16.mxu0 %v4480_v37  ;;  %1656 = vmatprep.subr.bf16.mxu1 %v4483_v38  ;;  %v4575_v37 = vld [vmem:[%s6564_s1 + $0x4ec] ss:$16 sps:$4 sm:$0xff]   ;;  %v4570_v38 = vld [vmem:[%s6564_s1 + $0x4e0] ss:$16 sps:$4 sm:$0xff]  }
  0x63   :  { %1493 = vmatpush1.bf16.msra.mxu0 %v4478_v39  ;;  %1657 = vmatpush1.bf16.msra.mxu1 %v4481_v40  ;;  %v4573_v39 = vld [vmem:[%s6564_s1 + $0x4e8] ss:$16 sps:$4 sm:$0xff]   ;;  %v4578_v40 = vld [vmem:[%s6564_s1 + $0x504] ss:$16 sps:$4 sm:$0xff]  }
  0x64   :  { %1494 = vmatprep.subr.bf16.mxu0 %v4486_v41  ;;  %1658 = vmatprep.subr.bf16.mxu1 %v4489_v42  ;;  %v4581_v41 = vld [vmem:[%s6564_s1 + $0x50c] ss:$16 sps:$4 sm:$0xff]   ;;  %v4576_v42 = vld [vmem:[%s6564_s1 + $0x500] ss:$16 sps:$4 sm:$0xff]  }
  0x67   :  { %1495 = vmatpush1.bf16.msra.mxu0 %v4484_v43  ;;  %1659 = vmatpush1.bf16.msra.mxu1 %v4487_v44  ;;  %v4579_v43 = vld [vmem:[%s6564_s1 + $0x508] ss:$16 sps:$4 sm:$0xff]   ;;  %v4584_v44 = vld [vmem:[%s6564_s1 + $0x524] ss:$16 sps:$4 sm:$0xff]  }
  0x68   :  { %1496 = vmatprep.subr.bf16.mxu0 %v4492_v45  ;;  %1660 = vmatprep.subr.bf16.mxu1 %v4495_v46  ;;  %v4587_v45 = vld [vmem:[%s6564_s1 + $0x52c] ss:$16 sps:$4 sm:$0xff]   ;;  %v4582_v46 = vld [vmem:[%s6564_s1 + $0x520] ss:$16 sps:$4 sm:$0xff]  }
  0x6b   :  { %1497 = vmatpush1.bf16.msra.mxu0 %v4490_v47  ;;  %1661 = vmatpush1.bf16.msra.mxu1 %v4493_v48  ;;  %v4585_v47 = vld [vmem:[%s6564_s1 + $0x528] ss:$16 sps:$4 sm:$0xff]   ;;  %v4590_v48 = vld [vmem:[%s6564_s1 + $0x544] ss:$16 sps:$4 sm:$0xff]  }
  0x6c   :  { %1498 = vmatprep.subr.bf16.mxu0 %v4498_v49  ;;  %1662 = vmatprep.subr.bf16.mxu1 %v4501_v50  ;;  %v4593_v49 = vld [vmem:[%s6564_s1 + $0x54c] ss:$16 sps:$4 sm:$0xff]   ;;  %v4588_v50 = vld [vmem:[%s6564_s1 + $0x540] ss:$16 sps:$4 sm:$0xff]  }
  0x6f   :  { %1499 = vmatpush1.bf16.msra.mxu0 %v4496_v51  ;;  %1663 = vmatpush1.bf16.msra.mxu1 %v4499_v52  ;;  %v4591_v51 = vld [vmem:[%s6564_s1 + $0x548] ss:$16 sps:$4 sm:$0xff]   ;;  %v4596_v52 = vld [vmem:[%s6564_s1 + $0x564] ss:$16 sps:$4 sm:$0xff]  }
  0x70   :  { %1500 = vmatprep.subr.bf16.mxu0 %v4504_v53  ;;  %1664 = vmatprep.subr.bf16.mxu1 %v4507_v54  ;;  %v4599_v53 = vld [vmem:[%s6564_s1 + $0x56c] ss:$16 sps:$4 sm:$0xff]   ;;  %v4594_v54 = vld [vmem:[%s6564_s1 + $0x560] ss:$16 sps:$4 sm:$0xff]  }
  0x73   :  { %1501 = vmatpush1.bf16.msra.mxu0 %v4502_v55  ;;  %1665 = vmatpush1.bf16.msra.mxu1 %v4505_v56  ;;  %v4597_v55 = vld [vmem:[%s6564_s1 + $0x568] ss:$16 sps:$4 sm:$0xff]   ;;  %v4602_v56 = vld [vmem:[%s6564_s1 + $0x584] ss:$16 sps:$4 sm:$0xff]  }
  0x74   :  { %1502 = vmatprep.subr.bf16.mxu0 %v4510_v57  ;;  %1666 = vmatprep.subr.bf16.mxu1 %v4513_v58  ;;  %v4605_v57 = vld [vmem:[%s6564_s1 + $0x58c] ss:$16 sps:$4 sm:$0xff]   ;;  %v4600_v58 = vld [vmem:[%s6564_s1 + $0x580] ss:$16 sps:$4 sm:$0xff]  }
  0x77   :  { %1503 = vmatpush1.bf16.msra.mxu0 %v4508_v59  ;;  %1667 = vmatpush1.bf16.msra.mxu1 %v4511_v60  ;;  %v4603_v59 = vld [vmem:[%s6564_s1 + $0x588] ss:$16 sps:$4 sm:$0xff]   ;;  %v4608_v60 = vld [vmem:[%s6564_s1 + $0x5a4] ss:$16 sps:$4 sm:$0xff]  }
  0x78   :  { %1504 = vmatprep.subr.bf16.mxu0 %v4516_v61  ;;  %1668 = vmatprep.subr.bf16.mxu1 %v4519_v62  ;;  %v4611_v61 = vld [vmem:[%s6564_s1 + $0x5ac] ss:$16 sps:$4 sm:$0xff]   ;;  %v4606_v62 = vld [vmem:[%s6564_s1 + $0x5a0] ss:$16 sps:$4 sm:$0xff]  }
  0x7b   :  { %1505 = vmatpush1.bf16.msra.mxu0 %v4514_v63  ;;  %1669 = vmatpush1.bf16.msra.mxu1 %v4517_v0  ;;  %v4609_v63 = vld [vmem:[%s6564_s1 + $0x5a8] ss:$16 sps:$4 sm:$0xff]   ;;  %v4614_v0 = vld [vmem:[%s6564_s1 + $0x5c4] ss:$16 sps:$4 sm:$0xff]  }
  0x7c   :  { %1506 = vmatprep.subr.bf16.mxu0 %v4522_v1  ;;  %1670 = vmatprep.subr.bf16.mxu1 %v4525_v2  ;;  %v4617_v1 = vld [vmem:[%s6564_s1 + $0x5cc] ss:$16 sps:$4 sm:$0xff]   ;;  %v4612_v2 = vld [vmem:[%s6564_s1 + $0x5c0] ss:$16 sps:$4 sm:$0xff]  }
  0x7f   :  { %1507 = vmatpush1.bf16.msra.mxu0 %v4520_v3  ;;  %1671 = vmatpush1.bf16.msra.mxu1 %v4523_v4  ;;  %v4615_v3 = vld [vmem:[%s6564_s1 + $0x5c8] ss:$16 sps:$4 sm:$0xff]   ;;  %v4620_v4 = vld [vmem:[%s6564_s1 + $0x5e4] ss:$16 sps:$4 sm:$0xff]  }
  0x80   :  { %1517 = vmatprep.subr.bf16.mxu0 %v4530_v5  ;;  %1681 = vmatprep.subr.bf16.mxu1 %v4533_v6  ;;  %v4623_v5 = vld [vmem:[%s6564_s1 + $0x5ec] ss:$16 sps:$4 sm:$0xff]   ;;  %v4618_v6 = vld [vmem:[%s6564_s1 + $0x5e0] ss:$16 sps:$4 sm:$0xff]  }
  0x82   :  { %1509 = vmatmul.mubr.bf16.vlgmr.msra.gmra.mrb[0].mxu0 %v3784_v7  ;;  %1673 = vmatmul.mubr.bf16.vlgmr.msra.gmra.mrb[0].mxu1 %v3784_v7  ;;  %v4621_v7 = vld [vmem:[%s6564_s1 + $0x5e8] ss:$16 sps:$4 sm:$0xff]  }
  0x83   :  { %1518 = vmatpush1.bf16.msra.mxu0 %v4528_v8  ;;  %1682 = vmatpush1.bf16.msra.mxu1 %v4531_v9  ;;  %v4628_v8 = vld [vmem:[%s6564_s1 + $0x604] ss:$16 sps:$4 sm:$0xff]   ;;  %v4631_v9 = vld [vmem:[%s6564_s1 + $0x60c] ss:$16 sps:$4 sm:$0xff]  }
  0x84   :  { %1519 = vmatprep.subr.bf16.mxu0 %v4536_v10  ;;  %1683 = vmatprep.subr.bf16.mxu1 %v4539_v12  ;;  %v4626_v10 = vld [vmem:[%s6564_s1 + $0x600] ss:$16 sps:$4 sm:$0xff]   ;;  %v4629_v12 = vld [vmem:[%s6564_s1 + $0x608] ss:$16 sps:$4 sm:$0xff]  }
  0x85   :  { %1549 = vmatprep.mubr.bf16.mxu0 %v3787_v13  ;;  %1713 = vmatprep.mubr.bf16.mxu1 %v3787_v13  ;;  %v3786_v13 = vcombine.low %v5516_v11, %v5516_v11  ;;  %v4635_v11 = vld [vmem:[%s6564_s1 + $0x628] ss:$16 sps:$4 sm:$0xff]  }
  0x87   :  { %1520 = vmatpush1.bf16.msra.mxu0 %v4534_v14  ;;  %1684 = vmatpush1.bf16.msra.mxu1 %v4537_v15  ;;  %v4634_v14 = vld [vmem:[%s6564_s1 + $0x624] ss:$16 sps:$4 sm:$0xff]   ;;  %v4637_v15 = vld [vmem:[%s6564_s1 + $0x62c] ss:$16 sps:$4 sm:$0xff]  }
  0x88   :  { %1521 = vmatprep.subr.bf16.mxu0 %v4542_v16  ;;  %1685 = vmatprep.subr.bf16.mxu1 %v4545_v17  ;;  %v4632_v16 = vld [vmem:[%s6564_s1 + $0x620] ss:$16 sps:$4 sm:$0xff]   ;;  %v4640_v17 = vld [vmem:[%s6564_s1 + $0x644] ss:$16 sps:$4 sm:$0xff]  }
  0x8b   :  { %1522 = vmatpush1.bf16.msra.mxu0 %v4540_v18  ;;  %1686 = vmatpush1.bf16.msra.mxu1 %v4543_v19  ;;  %v4643_v18 = vld [vmem:[%s6564_s1 + $0x64c] ss:$16 sps:$4 sm:$0xff]   ;;  %v4638_v19 = vld [vmem:[%s6564_s1 + $0x640] ss:$16 sps:$4 sm:$0xff]  }
  0x8c   :  { %1523 = vmatprep.subr.bf16.mxu0 %v4548_v20  ;;  %1687 = vmatprep.subr.bf16.mxu1 %v4551_v21  ;;  %v4641_v20 = vld [vmem:[%s6564_s1 + $0x648] ss:$16 sps:$4 sm:$0xff]   ;;  %v5038_v21 = vmov 0  }
  0x8f   :  { %1524 = vmatpush1.bf16.msra.mxu0 %v4546_v22  ;;  %1688 = vmatpush1.bf16.msra.mxu1 %v4549_v23  ;;  %v4646_v22 = vld [vmem:[%s6564_s1 + $0x664] ss:$16 sps:$4 sm:$0xff]   ;;  %v4649_v23 = vld [vmem:[%s6564_s1 + $0x66c] ss:$16 sps:$4 sm:$0xff]  }
  0x90   :  { %1525 = vmatprep.subr.bf16.mxu0 %v4554_v24  ;;  %1689 = vmatprep.subr.bf16.mxu1 %v4557_v25  ;;  %v4644_v24 = vld [vmem:[%s6564_s1 + $0x660] ss:$16 sps:$4 sm:$0xff]   ;;  %v4647_v25 = vld [vmem:[%s6564_s1 + $0x668] ss:$16 sps:$4 sm:$0xff]  }
  0x93   :  { %1526 = vmatpush1.bf16.msra.mxu0 %v4552_v26  ;;  %1690 = vmatpush1.bf16.msra.mxu1 %v4555_v27  ;;  %v4652_v26 = vld [vmem:[%s6564_s1 + $0x684] ss:$16 sps:$4 sm:$0xff]   ;;  %v4655_v27 = vld [vmem:[%s6564_s1 + $0x68c] ss:$16 sps:$4 sm:$0xff]  }
  0x94   :  { %1527 = vmatprep.subr.bf16.mxu0 %v4560_v28  ;;  %1691 = vmatprep.subr.bf16.mxu1 %v4563_v29  ;;  %v4650_v28 = vld [vmem:[%s6564_s1 + $0x680] ss:$16 sps:$4 sm:$0xff]   ;;  %v4653_v29 = vld [vmem:[%s6564_s1 + $0x688] ss:$16 sps:$4 sm:$0xff]  }
  0x97   :  { %1528 = vmatpush1.bf16.msra.mxu0 %v4558_v30  ;;  %1692 = vmatpush1.bf16.msra.mxu1 %v4561_v31  ;;  %v4658_v30 = vld [vmem:[%s6564_s1 + $0x6a4] ss:$16 sps:$4 sm:$0xff]   ;;  %v4661_v31 = vld [vmem:[%s6564_s1 + $0x6ac] ss:$16 sps:$4 sm:$0xff]  }
  0x98   :  { %1529 = vmatprep.subr.bf16.mxu0 %v4566_v32  ;;  %1693 = vmatprep.subr.bf16.mxu1 %v4569_v33  ;;  %v4656_v32 = vld [vmem:[%s6564_s1 + $0x6a0] ss:$16 sps:$4 sm:$0xff]   ;;  %v4659_v33 = vld [vmem:[%s6564_s1 + $0x6a8] ss:$16 sps:$4 sm:$0xff]  }
  0x9b   :  { %1530 = vmatpush1.bf16.msra.mxu0 %v4564_v34  ;;  %1694 = vmatpush1.bf16.msra.mxu1 %v4567_v35  ;;  %v4664_v34 = vld [vmem:[%s6564_s1 + $0x6c4] ss:$16 sps:$4 sm:$0xff]   ;;  %v4667_v35 = vld [vmem:[%s6564_s1 + $0x6cc] ss:$16 sps:$4 sm:$0xff]  }
  0x9c   :  { %1531 = vmatprep.subr.bf16.mxu0 %v4572_v36  ;;  %1695 = vmatprep.subr.bf16.mxu1 %v4575_v37  ;;  %v4662_v36 = vld [vmem:[%s6564_s1 + $0x6c0] ss:$16 sps:$4 sm:$0xff]   ;;  %v4665_v37 = vld [vmem:[%s6564_s1 + $0x6c8] ss:$16 sps:$4 sm:$0xff]  }
  0x9f   :  { %1532 = vmatpush1.bf16.msra.mxu0 %v4570_v38  ;;  %1696 = vmatpush1.bf16.msra.mxu1 %v4573_v39  ;;  %v4670_v38 = vld [vmem:[%s6564_s1 + $0x6e4] ss:$16 sps:$4 sm:$0xff]   ;;  %v4673_v39 = vld [vmem:[%s6564_s1 + $0x6ec] ss:$16 sps:$4 sm:$0xff]  }
  0xa0   :  { %1533 = vmatprep.subr.bf16.mxu0 %v4578_v40  ;;  %1697 = vmatprep.subr.bf16.mxu1 %v4581_v41  ;;  %v4668_v40 = vld [vmem:[%s6564_s1 + $0x6e0] ss:$16 sps:$4 sm:$0xff]   ;;  %v4671_v41 = vld [vmem:[%s6564_s1 + $0x6e8] ss:$16 sps:$4 sm:$0xff]  }
  0xa3   :  { %1534 = vmatpush1.bf16.msra.mxu0 %v4576_v42  ;;  %1698 = vmatpush1.bf16.msra.mxu1 %v4579_v43  ;;  %v4676_v42 = vld [vmem:[%s6566_s3 + $0x40] sm:$0xff]   ;;  %v4674_v43 = vld [vmem:[%s6563_s0 + $0x18] ss:$0 sps:$4 sm:$0xff]  }
  0xa4   :  { %1535 = vmatprep.subr.bf16.mxu0 %v4584_v44  ;;  %1699 = vmatprep.subr.bf16.mxu1 %v4587_v45  ;;  %v4675_v44 = vld [vmem:[%s6566_s3 + $0x80] sm:$0xff]  }
  0xa5   :  { %v4677_v45 = vld [vmem:[%s6566_s3] sm:$0xff]  }
  0xa7   :  { %1536 = vmatpush1.bf16.msra.mxu0 %v4582_v46  ;;  %1700 = vmatpush1.bf16.msra.mxu1 %v4585_v47  ;;  %v4679_v46 = vld [vmem:[%s6566_s3 + $0x48] sm:$0xff]  }
  0xa8   :  { %1537 = vmatprep.subr.bf16.mxu0 %v4590_v48  ;;  %1701 = vmatprep.subr.bf16.mxu1 %v4593_v49  ;;  %v4678_v47 = vld [vmem:[%s6566_s3 + $0x88] sm:$0xff]   ;;  %v4682_v49 = vld [vmem:[%s6566_s3 + $0x50] sm:$0xff]  }
  0xa9   :  { %v4680_v48 = vld [vmem:[%s6566_s3 + $0x8] sm:$0xff]  }
  0xab   :  { %1538 = vmatpush1.bf16.msra.mxu0 %v4588_v50  ;;  %1702 = vmatpush1.bf16.msra.mxu1 %v4591_v51  ;;  %v4681_v50 = vld [vmem:[%s6566_s3 + $0x90] sm:$0xff]  }
  0xac   :  { %1539 = vmatprep.subr.bf16.mxu0 %v4596_v52  ;;  %1703 = vmatprep.subr.bf16.mxu1 %v4599_v53  ;;  %v4683_v51 = vld [vmem:[%s6566_s3 + $0x10] sm:$0xff]   ;;  %v4685_v52 = vld [vmem:[%s6566_s3 + $0x58] sm:$0xff]  }
  0xad   :  { %v4684_v53 = vld [vmem:[%s6566_s3 + $0x98] sm:$0xff]  }
  0xaf   :  { %1540 = vmatpush1.bf16.msra.mxu0 %v4594_v54  ;;  %1704 = vmatpush1.bf16.msra.mxu1 %v4597_v55  ;;  %v4686_v54 = vld [vmem:[%s6566_s3 + $0x18] sm:$0xff]   ;;  %v4688_v55 = vld [vmem:[%s6566_s3 + $0x60] sm:$0xff]  }
  0xb0   :  { %1541 = vmatprep.subr.bf16.mxu0 %v4602_v56  ;;  %1705 = vmatprep.subr.bf16.mxu1 %v4605_v57  ;;  %v4687_v56 = vld [vmem:[%s6566_s3 + $0xa0] sm:$0xff]  }
  0xb1   :  { %v4689_v57 = vld [vmem:[%s6566_s3 + $0x20] sm:$0xff]  }
  0xb3   :  { %1542 = vmatpush1.bf16.msra.mxu0 %v4600_v58  ;;  %1706 = vmatpush1.bf16.msra.mxu1 %v4603_v59  ;;  %v4691_v58 = vld [vmem:[%s6566_s3 + $0x68] sm:$0xff]  }
  0xb4   :  { %1543 = vmatprep.subr.bf16.mxu0 %v4608_v60  ;;  %1707 = vmatprep.subr.bf16.mxu1 %v4611_v61 }
  0xb7   :  { %1544 = vmatpush1.bf16.msra.mxu0 %v4606_v62  ;;  %1708 = vmatpush1.bf16.msra.mxu1 %v4609_v63 }
  0xb8   :  { %1545 = vmatprep.subr.bf16.mxu0 %v4614_v0  ;;  %1709 = vmatprep.subr.bf16.mxu1 %v4617_v1 }
  0xbb   :  { %1546 = vmatpush1.bf16.msra.mxu0 %v4612_v2  ;;  %1710 = vmatpush1.bf16.msra.mxu1 %v4615_v3 }
  0xbc   :  { %1547 = vmatprep.subr.bf16.mxu0 %v4620_v4  ;;  %1711 = vmatprep.subr.bf16.mxu1 %v4623_v5 }
  0xbf   :  { %1548 = vmatpush1.bf16.msra.mxu0 %v4618_v6  ;;  %1712 = vmatpush1.bf16.msra.mxu1 %v4621_v7 }
  0xc0   :  { %1558 = vmatprep.subr.bf16.mxu0 %v4628_v8  ;;  %1722 = vmatprep.subr.bf16.mxu1 %v4631_v9 }
  0xc2   :  { %1550 = vmatmul.mubr.bf16.vlgmr.msra.gmra.mrb[0].mxu0 %v3786_v13  ;;  %1714 = vmatmul.mubr.bf16.vlgmr.msra.gmra.mrb[0].mxu1 %v3786_v13 }
  0xc3   :  { %1559 = vmatpush1.bf16.msra.mxu0 %v4626_v10  ;;  %1723 = vmatpush1.bf16.msra.mxu1 %v4629_v12 }
  0xc4   :  { %1560 = vmatprep.subr.bf16.mxu0 %v4634_v14  ;;  %1724 = vmatprep.subr.bf16.mxu1 %v4637_v15 }
  0xc5   :  { %1590 = vmatprep.mubr.bf16.mxu0 %v5038_v21  ;;  %1754 = vmatprep.mubr.bf16.mxu1 %v5038_v21 }
  0xc7   :  { %1561 = vmatpush1.bf16.msra.mxu0 %v4632_v16  ;;  %1725 = vmatpush1.bf16.msra.mxu1 %v4635_v11 }
  0xc8   :  { %1562 = vmatprep.subr.bf16.mxu0 %v4640_v17  ;;  %1726 = vmatprep.subr.bf16.mxu1 %v4643_v18 }
  0xcb   :  { %1563 = vmatpush1.bf16.msra.mxu0 %v4638_v19  ;;  %1727 = vmatpush1.bf16.msra.mxu1 %v4641_v20 }
  0xcc   :  { %1564 = vmatprep.subr.bf16.mxu0 %v4646_v22  ;;  %1728 = vmatprep.subr.bf16.mxu1 %v4649_v23 }
  0xcf   :  { %1565 = vmatpush1.bf16.msra.mxu0 %v4644_v24  ;;  %1729 = vmatpush1.bf16.msra.mxu1 %v4647_v25 }
  0xd0   :  { %1566 = vmatprep.subr.bf16.mxu0 %v4652_v26  ;;  %1730 = vmatprep.subr.bf16.mxu1 %v4655_v27 }
  0xd3   :  { %1567 = vmatpush1.bf16.msra.mxu0 %v4650_v28  ;;  %1731 = vmatpush1.bf16.msra.mxu1 %v4653_v29 }
  0xd4   :  { %1568 = vmatprep.subr.bf16.mxu0 %v4658_v30  ;;  %1732 = vmatprep.subr.bf16.mxu1 %v4661_v31 }
  0xd7   :  { %1569 = vmatpush1.bf16.msra.mxu0 %v4656_v32  ;;  %1733 = vmatpush1.bf16.msra.mxu1 %v4659_v33 }
  0xd8   :  { %1570 = vmatprep.subr.bf16.mxu0 %v4664_v34  ;;  %1734 = vmatprep.subr.bf16.mxu1 %v4667_v35 }
  0xdb   :  { %1571 = vmatpush1.bf16.msra.mxu0 %v4662_v36  ;;  %1735 = vmatpush1.bf16.msra.mxu1 %v4665_v37 }
  0xdc   :  { %1572 = vmatprep.subr.bf16.mxu0 %v4670_v38  ;;  %1736 = vmatprep.subr.bf16.mxu1 %v4673_v39 }
  0xdf   :  { %1573 = vmatpush1.bf16.msra.mxu0 %v4668_v40  ;;  %1737 = vmatpush1.bf16.msra.mxu1 %v4671_v41 }
  0xe0   :  { %2022 = vmatprep.subr.bf16.mxu1 %v5038_v21  ;;  %4238 = vmatprep.subr.bf16.mxu0 %v4676_v42 }
  0xe2   :  { %1591 = vmatmul.mubr.bf16.vlgmr.msra.gmra.mrb[0].mxu0 %v4674_v43  ;;  %1755 = vmatmul.mubr.bf16.vlgmr.msra.gmra.mrb[0].mxu1 %v4674_v43 }
  0xe3   :  { %2023 = vmatpush1.bf16.msra.mxu1 %v4675_v44  ;;  %4239 = vmatpush3.bf16.msra.mxu0 %v4677_v45 }
  0xe4   :  { %2024 = vmatprep.subr.bf16.mxu1 %v5038_v21  ;;  %4240 = vmatprep.subr.bf16.mxu0 %v4679_v46 }
  0xe7   :  { %2025 = vmatpush1.bf16.msra.mxu1 %v4678_v47  ;;  %4241 = vmatpush3.bf16.msra.mxu0 %v4680_v48 }
  0xe8   :  { %2026 = vmatprep.subr.bf16.mxu1 %v5038_v21  ;;  %4242 = vmatprep.subr.bf16.mxu0 %v4682_v49 }
  0xeb   :  { %2027 = vmatpush1.bf16.msra.mxu1 %v4681_v50  ;;  %4243 = vmatpush3.bf16.msra.mxu0 %v4683_v51 }
  0xec   :  { %2028 = vmatprep.subr.bf16.mxu1 %v5038_v21  ;;  %4244 = vmatprep.subr.bf16.mxu0 %v4685_v52 }
  0xef   :  { %2029 = vmatpush1.bf16.msra.mxu1 %v4684_v53  ;;  %4245 = vmatpush3.bf16.msra.mxu0 %v4686_v54 }
  0xf0   :  { %2030 = vmatprep.subr.bf16.mxu1 %v5038_v21  ;;  %4246 = vmatprep.subr.bf16.mxu0 %v4688_v55 }
  0xf1   :  { %18 = vsyncpa [#allocation5], 0  ;;  %v4690_v59 = vld [vmem:[%s6566_s3 + $0xa8] sm:$0xff]   ;;  %v4693_v61 = vld [vmem:[%s6566_s3 + $0xb0] sm:$0xff]   ;;  %v270_v4 = vlaneseq  ;;  %vm1978_vm0 = vcmask 130048   ;;  %vm2135_vm1 = vcmask 1041408  }
  0xf2   :  { %v4692_v60 = vld [vmem:[%s6566_s3 + $0x28] sm:$0xff]   ;;  %v4694_v62 = vld [vmem:[%s6566_s3 + $0x70] sm:$0xff]   ;;  %v4696_v0 = vld [vmem:[%s6566_s3 + $0xb8] sm:$0xff]   ;;  %s5039_s13 = smov 108   ;;  %vm2131_vm2 = vcmask 162816  }
  0xf3   :  { %2031 = vmatpush1.bf16.msra.mxu1 %v4687_v56  ;;  %4247 = vmatpush3.bf16.msra.mxu0 %v4689_v57  ;;  %v4695_v63 = vld [vmem:[%s6566_s3 + $0x30] sm:$0xff]   ;;  %v4697_v1 = vld [vmem:[%s6566_s3 + $0x78] sm:$0xff]   ;;  %v4699_v3 = vld [vmem:[%s6566_s3 + $0xc0] sm:$0xff]   ;;  %v5884_v5 = vshrl.u32 %v270_v4, 7 }
  0xf4   :  { %2032 = vmatprep.subr.bf16.mxu1 %v5038_v21  ;;  %4248 = vmatprep.subr.bf16.mxu0 %v4691_v58  ;;  %v4698_v2 = vld [vmem:[%s6566_s3 + $0x38] sm:$0xff]   ;;  %v268_v8 = vld [vmem:[%s6565_s2] sm:$0xf]  ;;  %v4702_v37 = vld [vmem:[%s6568_s5 + $0x4] ss:$16 sps:$4 sm:$0xff]  }
  0xf5   :  { %v5887_v6 = vsub.s32 0, %v5884_v5  ;;  %v5890_v7 = vsub.s32 2, %v5884_v5  ;;  %v5896_v9 = vsub.s32 1, %v5884_v5  ;;  %v5899_v10 = vsub.s32 3, %v5884_v5  ;;  %v4700_v36 = vld [vmem:[%s6568_s5] ss:$16 sps:$4 sm:$0xff]  }
  0xf6   :  { %v4013_v40 = vld [vmem:[%s6567_s4] ss:$0 sm:$0xff]  ;;  %v4707_v56 = vld [vmem:[%s6568_s5 + $0xc] ss:$16 sps:$4 sm:$0xff]  }
  0xf7   :  { %2033 = vmatpush1.bf16.msra.mxu1 %v4690_v59  ;;  %4249 = vmatpush3.bf16.msra.mxu0 %v4692_v60  ;;  %v273_v12 = vrot.slane %v268_v8, %v5887_v6  ;;  %v281_v13 = vrot.slane %v268_v8, %v5890_v7  ;;  %v277_v14 = vrot.slane %v268_v8, %v5896_v9  ;;  %v2077_v51 = vld [vmem:[%s6568_s5 + $0x20] sm:$0x33]  ;;  %v4718_v60 = vld [vmem:[%s6570_s7 + $0x3c] ss:$28 sps:$4 sm:$0xff]  }
  0xf8   :  { %2034 = vmatprep.subr.bf16.mxu1 %v5038_v21  ;;  %4250 = vmatprep.subr.bf16.mxu0 %v4694_v62  ;;  %v285_v15 = vrot.slane %v268_v8, %v5899_v10  ;;  %v4045_v53 = vcombine.high %v2077_v51, %v2077_v51  ;;  %v4044_v54 = vcombine.low %v2077_v51, %v2077_v51  ;;  %v4710_v58 = vld [vmem:[%s6570_s7] ss:$28 sps:$4 sm:$0xff]   ;;  %v4724_v62 = vld [vmem:[%s6570_s7 + $0x74] ss:$28 sps:$4 sm:$0xff]  }
  0xf9   :  { %v4712_v59 = vld [vmem:[%s6570_s7 + $0x4] ss:$28 sps:$4 sm:$0xff]   ;;  %v4742_v4 = vld [vmem:[%s6570_s7 + $0x11c] ss:$28 sps:$4 sm:$0xff]  }
  0xfa   :  { %v2137_v55 = vsel %vm2135_vm1, %v4044_v54, 0  ;;  %v4740_v8 = vld [vmem:[%s6570_s7 + $0x118] ss:$28 sps:$4 sm:$0xff]   ;;  %v4763_v54 = vld [vmem:[%s6570_s7 + $0x1cc] ss:$28 sps:$4 sm:$0xff]  }
  0xfb   :  { %2035 = vmatpush1.bf16.msra.mxu1 %v4693_v61  ;;  %4251 = vmatpush3.bf16.msra.mxu0 %v4695_v63  ;;  %v4716_v61 = vld [vmem:[%s6570_s7 + $0x38] ss:$28 sps:$4 sm:$0xff]   ;;  %v4722_v63 = vld [vmem:[%s6570_s7 + $0x70] ss:$28 sps:$4 sm:$0xff]  }
  0xfc   :  { %2036 = vmatprep.subr.bf16.mxu1 %v5038_v21  ;;  %4252 = vmatprep.subr.bf16.mxu0 %v4697_v1  ;;  %v4728_v1 = vld [vmem:[%s6570_s7 + $0xa8] ss:$28 sps:$4 sm:$0xff]   ;;  %v4749_v51 = vld [vmem:[%s6570_s7 + $0x158] ss:$28 sps:$4 sm:$0xff]  }
  0xff   :  { %2037 = vmatpush1.bf16.msra.mxu1 %v4696_v0  ;;  %4253 = vmatpush3.bf16.msra.mxu0 %v4698_v2  ;;  %v4730_v0 = vld [vmem:[%s6570_s7 + $0xac] ss:$28 sps:$4 sm:$0xff]   ;;  %v4736_v2 = vld [vmem:[%s6570_s7 + $0xe4] ss:$28 sps:$4 sm:$0xff]  }
 0x100   :  { %2038 = vmatprep.subr.bf16.mxu1 %v5038_v21  ;;  %3378 = vmatprep.subr.bf16.mxu0 %v4712_v59  ;;  %v4773_v59 = vld [vmem:[%s6570_s7 + $0x238] ss:$28 sps:$4 sm:$0xff]  }
 0x103   :  { %2039 = vmatpush1.bf16.msra.mxu1 %v4699_v3  ;;  %v4734_v3 = vld [vmem:[%s6570_s7 + $0xe0] ss:$28 sps:$4 sm:$0xff]  }
 0x104   :  { %2148 = vmatprep.subr.bf16.mxu1 %v4702_v37 }
 0x1b5   :  { %v1592_v16 = vpop.f32.mrb[0].mxu0  ;;  %v1756_v11 = vpop.f32.mrb[0].mxu1 }
 0x1b6   :  { %v4282_v17 = vadd.f32 %v1592_v16, %v273_v12  ;;  %v4284_v18 = vadd.f32 %v1756_v11, %v281_v13  ;;  %v1594_v19 = vpop.f32.mrb[1].mxu0  ;;  %v1758_v20 = vpop.f32.mrb[1].mxu1  ;;  %v4748_v12 = vld [vmem:[%s6570_s7 + $0x154] ss:$28 sps:$4 sm:$0xff]   ;;  %v4760_v16 = vld [vmem:[%s6570_s7 + $0x1c4] ss:$28 sps:$4 sm:$0xff]  }
 0x1b7   :  { %v4283_v22 = vadd.f32 %v1594_v19, %v277_v14  ;;  %v4285_v23 = vadd.f32 %v1758_v20, %v285_v15  ;;  %v1596_v24 = vpop.f32.mrb[2].mxu0  ;;  %v1760_v25 = vpop.f32.mrb[2].mxu1  ;;  %v4746_v13 = vld [vmem:[%s6570_s7 + $0x150] ss:$28 sps:$4 sm:$0xff]   ;;  %v4752_v15 = vld [vmem:[%s6570_s7 + $0x188] ss:$28 sps:$4 sm:$0xff]  }
 0x1b8   :  { %v1763_v26 = vmax.f32 %v4282_v17, 0.0  ;;  %v1765_v27 = vmax.f32 %v4284_v18, 0.0  ;;  %v1597_v28 = vpop.f32.mrb[3].mxu0  ;;  %v1761_v29 = vpop.f32.mrb[3].mxu1  ;;  %v4754_v14 = vld [vmem:[%s6570_s7 + $0x18c] ss:$28 sps:$4 sm:$0xff]  }
 0x1b9   :  { %v1764_v30 = vmax.f32 %v4283_v22, 0.0  ;;  %v1766_v31 = vmax.f32 %v4285_v23, 0.0  ;;  %v4758_v11 = vld [vmem:[%s6570_s7 + $0x1c0] ss:$28 sps:$4 sm:$0xff]   ;;  %v4764_v18 = vld [vmem:[%s6570_s7 + $0x1f8] ss:$28 sps:$4 sm:$0xff]  }
 0x1ba   :  { %v1767_v34 = vpack.c.bf16 %v1763_v26, %v1763_v26  ;;  %v1769_v35 = vpack.c.bf16 %v1765_v27, %v1765_v27  ;;  %v4766_v17 = vld [vmem:[%s6570_s7 + $0x1fc] ss:$28 sps:$4 sm:$0xff]   ;;  %v4772_v19 = vld [vmem:[%s6570_s7 + $0x234] ss:$28 sps:$4 sm:$0xff]   ;;  %v4778_v22 = vld [vmem:[%s6570_s7 + $0x26c] ss:$28 sps:$4 sm:$0xff]  }
 0x1bb   :  { %v1768_v32 = vpack.c.bf16 %v1764_v30, %v1764_v30  ;;  %v1770_v33 = vpack.c.bf16 %v1766_v31, %v1766_v31  ;;  %v4770_v20 = vld [vmem:[%s6570_s7 + $0x230] ss:$28 sps:$4 sm:$0xff]   ;;  %v4776_v23 = vld [vmem:[%s6570_s7 + $0x268] ss:$28 sps:$4 sm:$0xff]   ;;  %v4782_v25 = vld [vmem:[%s6570_s7 + $0x2a0] ss:$28 sps:$4 sm:$0xff]  }
 0x1bc   :  { %v4784_v24 = vld [vmem:[%s6570_s7 + $0x2a4] ss:$28 sps:$4 sm:$0xff]   ;;  %v4790_v26 = vld [vmem:[%s6570_s7 + $0x2dc] ss:$28 sps:$4 sm:$0xff]   ;;  %v2078_v31 = vld [vmem:[%s6568_s5 + $0x28] sm:$0x33] }
 0x1bd   :  { %2014 = vmatprep.mubr.bf16.mxu0 %v1768_v32  ;;  %4039 = vmatprep.mubr.msk.bf16.mxu1 %vm1978_vm0, %v1770_v33  ;;  %v4788_v27 = vld [vmem:[%s6570_s7 + $0x2d8] ss:$28 sps:$4 sm:$0xff]   ;;  %v2062_v28 = vld [vmem:[%s6572_s9] sm:$0xff] }
 0x1be   :  { %2015 = vmatmul.mubr.bf16.vlgmr.msra.gmra.mrb[4].mxu0 %v1767_v34  ;;  %2055 = vmatmul.mubr.bf16.vlgmr.msra.gmra.mrb[4].mxu1 %v1769_v35  ;;  %v4705_v33 = vld [vmem:[%s6568_s5 + $0x8] ss:$16 sps:$4 sm:$0xff]   ;;  %v4047_v35 = vcombine.high %v2078_v31, %v2078_v31 }
 0x1bf   :  { %2180 = vmatprep.mubr.bf16.mxu1 %v5038_v21  ;;  %2149 = vmatpush1.bf16.msra.mxu1 %v4700_v36  ;;  %v4046_v36 = vcombine.low %v2078_v31, %v2078_v31  ;;  %v4809_v31 = vld [vmem:[%s6570_s7 + $0x388] ss:$28 sps:$4 sm:$0xff]  }
 0x1c0   :  { %4048 = vmatprep.subr.msk.bf16.mxu1 %vm2135_vm1, %v4045_v53  ;;  %3379 = vmatpush1.bf16.msra.mxu0 %v4710_v58  ;;  %v4755_v53 = vld [vmem:[%s6570_s7 + $0x190] ss:$28 sps:$4 sm:$0xff]   ;;  %v4775_v58 = vld [vmem:[%s6570_s7 + $0x23c] ss:$28 sps:$4 sm:$0xff]  }
 0x1c1   :  { %3380 = vmatprep.subr.bf16.mxu0 %v4718_v60  ;;  %v2143_v37 = vsel %vm2135_vm1, %v4046_v36, 0  ;;  %v4781_v60 = vld [vmem:[%s6570_s7 + $0x274] ss:$28 sps:$4 sm:$0xff]  }
 0x1c3   :  { %2151 = vmatpush1.bf16.msra.mxu1 %v2137_v55  ;;  %v4761_v55 = vld [vmem:[%s6570_s7 + $0x1c8] ss:$28 sps:$4 sm:$0xff]  }
 0x1c4   :  { %2189 = vmatprep.subr.bf16.mxu1 %v4707_v56  ;;  %3381 = vmatpush1.bf16.msra.mxu0 %v4716_v61  ;;  %v4769_v56 = vld [vmem:[%s6570_s7 + $0x204] ss:$28 sps:$4 sm:$0xff]   ;;  %v4779_v61 = vld [vmem:[%s6570_s7 + $0x270] ss:$28 sps:$4 sm:$0xff]  }
 0x1c5   :  { %3382 = vmatprep.subr.bf16.mxu0 %v4724_v62  ;;  %v4787_v62 = vld [vmem:[%s6570_s7 + $0x2ac] ss:$28 sps:$4 sm:$0xff]  }
 0x1c8   :  { %3383 = vmatpush1.bf16.msra.mxu0 %v4722_v63  ;;  %v4785_v63 = vld [vmem:[%s6570_s7 + $0x2a8] ss:$28 sps:$4 sm:$0xff]  }
 0x1c9   :  { %3384 = vmatprep.subr.bf16.mxu0 %v4730_v0  ;;  %v4793_v0 = vld [vmem:[%s6570_s7 + $0x2e4] ss:$28 sps:$4 sm:$0xff]  }
 0x1cc   :  { %3385 = vmatpush1.bf16.msra.mxu0 %v4728_v1  ;;  %v4791_v1 = vld [vmem:[%s6570_s7 + $0x2e0] ss:$28 sps:$4 sm:$0xff]  }
 0x1cd   :  { %3386 = vmatprep.subr.bf16.mxu0 %v4736_v2  ;;  %v4796_v2 = vld [vmem:[%s6570_s7 + $0x314] ss:$28 sps:$4 sm:$0xff]  }
 0x1d0   :  { %3387 = vmatpush1.bf16.msra.mxu0 %v4734_v3  ;;  %v4799_v3 = vld [vmem:[%s6570_s7 + $0x31c] ss:$28 sps:$4 sm:$0xff]  }
 0x1d1   :  { %3388 = vmatprep.subr.bf16.mxu0 %v4742_v4  ;;  %v4794_v4 = vld [vmem:[%s6570_s7 + $0x310] ss:$28 sps:$4 sm:$0xff]  }
 0x1d4   :  { %3389 = vmatpush1.bf16.msra.mxu0 %v4740_v8  ;;  %v4797_v8 = vld [vmem:[%s6570_s7 + $0x318] ss:$28 sps:$4 sm:$0xff]  }
 0x1d5   :  { %3390 = vmatprep.subr.bf16.mxu0 %v4748_v12  ;;  %v4802_v12 = vld [vmem:[%s6570_s7 + $0x34c] ss:$28 sps:$4 sm:$0xff]  }
 0x1d8   :  { %3391 = vmatpush1.bf16.msra.mxu0 %v4746_v13  ;;  %v4805_v13 = vld [vmem:[%s6570_s7 + $0x354] ss:$28 sps:$4 sm:$0xff]  }
 0x1d9   :  { %3392 = vmatprep.subr.bf16.mxu0 %v4754_v14  ;;  %v4800_v14 = vld [vmem:[%s6570_s7 + $0x348] ss:$28 sps:$4 sm:$0xff]  }
 0x1dc   :  { %3393 = vmatpush1.bf16.msra.mxu0 %v4752_v15  ;;  %v4803_v15 = vld [vmem:[%s6570_s7 + $0x350] ss:$28 sps:$4 sm:$0xff]  }
 0x1dd   :  { %3394 = vmatprep.subr.bf16.mxu0 %v4760_v16  ;;  %v4808_v16 = vld [vmem:[%s6570_s7 + $0x384] ss:$28 sps:$4 sm:$0xff]  }
 0x1e0   :  { %3395 = vmatpush1.bf16.msra.mxu0 %v4758_v11  ;;  %v4811_v11 = vld [vmem:[%s6570_s7 + $0x38c] ss:$28 sps:$4 sm:$0xff]  }
 0x1e1   :  { %3396 = vmatprep.subr.bf16.mxu0 %v4766_v17  ;;  %v6142_v17 = vld [vmem:[%s6569_s6] sm:$0xf] }
 0x1e4   :  { %3397 = vmatpush1.bf16.msra.mxu0 %v4764_v18  ;;  %v2084_v18 = vrot.slane %v6142_v17, %v5887_v6 }
 0x1e5   :  { %3398 = vmatprep.subr.bf16.mxu0 %v4772_v19  ;;  %v2088_v19 = vrot.slane %v6142_v17, %v5896_v9 }
 0x1e8   :  { %3399 = vmatpush1.bf16.msra.mxu0 %v4770_v20 }
 0x1e9   :  { %3400 = vmatprep.subr.bf16.mxu0 %v4778_v22 }
 0x1ec   :  { %3401 = vmatpush1.bf16.msra.mxu0 %v4776_v23 }
 0x1ed   :  { %3402 = vmatprep.subr.bf16.mxu0 %v4784_v24 }
 0x1f0   :  { %3403 = vmatpush1.bf16.msra.mxu0 %v4782_v25 }
 0x1f1   :  { %3404 = vmatprep.subr.bf16.mxu0 %v4790_v26 }
 0x1f4   :  { %3405 = vmatpush1.bf16.msra.mxu0 %v4788_v27 }
 0x1f5   :  { %3406 = vmatprep.subr.bf16.mxu0 %v4796_v2  ;;  %v4850_v2 = vld [vmem:[%s6570_s7 + $0x50c] ss:$28 sps:$4 sm:$0xff]  }
 0x1f8   :  { %3407 = vmatpush1.bf16.msra.mxu0 %v4794_v4  ;;  %v4848_v4 = vld [vmem:[%s6570_s7 + $0x508] ss:$28 sps:$4 sm:$0xff]  }
 0x1f9   :  { %3408 = vmatprep.subr.bf16.mxu0 %v4802_v12 }
 0x1fc   :  { %3409 = vmatpush1.bf16.msra.mxu0 %v4800_v14  ;;  %v4859_v14 = vld [vmem:[%s6570_s7 + $0x54c] ss:$28 sps:$4 sm:$0xff]  }
 0x1fd   :  { %3419 = vmatprep.subr.bf16.mxu0 %v4808_v16  ;;  %v4857_v16 = vld [vmem:[%s6570_s7 + $0x548] ss:$28 sps:$4 sm:$0xff]  }
 0x291   :  { %v4254_v38 = vpop.f32.mrb[4].mxu0  ;;  %v2056_v39 = vpop.f32.mrb[4].mxu1 }
 0x292   :  { %v4255_v41 = vpop.f32.mrb[5].mxu0  ;;  %v2058_v42 = vpop.f32.mrb[5].mxu1 }
 0x293   :  { %v4256_v43 = vadd.f32 %v4255_v41, %v4254_v38  ;;  %v4257_v44 = vpop.f32.mrb[6].mxu0  ;;  %v2059_v45 = vpop.f32.mrb[6].mxu1  ;;  %v4715_v38 = vld [vmem:[%s6570_s7 + $0xc] ss:$28 sps:$4 sm:$0xff]   ;;  %v4719_v41 = vld [vmem:[%s6570_s7 + $0x40] ss:$28 sps:$4 sm:$0xff]  }
 0x294   :  { %v4258_v46 = vpop.f32.mrb[7].mxu0  ;;  %v2060_v47 = vpop.f32.mrb[7].mxu1  ;;  %v4727_v42 = vld [vmem:[%s6570_s7 + $0x7c] ss:$28 sps:$4 sm:$0xff]   ;;  %v4733_v44 = vld [vmem:[%s6570_s7 + $0xb4] ss:$28 sps:$4 sm:$0xff]  }
 0x295   :  { %v2017_v48 = vadd.f32 %v4256_v43, %v4013_v40  ;;  %v4721_v40 = vld [vmem:[%s6570_s7 + $0x44] ss:$28 sps:$4 sm:$0xff]   ;;  %v4725_v43 = vld [vmem:[%s6570_s7 + $0x78] ss:$28 sps:$4 sm:$0xff]   ;;  %v4731_v45 = vld [vmem:[%s6570_s7 + $0xb0] ss:$28 sps:$4 sm:$0xff]  }
 0x296   :  { %v4739_v46 = vld [vmem:[%s6570_s7 + $0xec] ss:$28 sps:$4 sm:$0xff]  }
 0x297   :  { %v5916_v49 = vadd.f32 %v2056_v39, %v2017_v48  ;;  %v4713_v39 = vld [vmem:[%s6570_s7 + $0x8] ss:$28 sps:$4 sm:$0xff]  }
 0x298   :  { %v4737_v47 = vld [vmem:[%s6570_s7 + $0xe8] ss:$28 sps:$4 sm:$0xff]  }
 0x299   :  { %v2063_v50 = vmul.f32 0.5, %v5916_v49  ;;  %3753 = vst [vmem:[#allocation4] sm:$0xff] %v5916_v49  ;;  %v4745_v48 = vld [vmem:[%s6570_s7 + $0x124] ss:$28 sps:$4 sm:$0xff]  }
 0x29b   :  { %v2064_v52 = vmul.f32 1.442695, %v2063_v50  ;;  %v4751_v50 = vld [vmem:[%s6570_s7 + $0x15c] ss:$28 sps:$4 sm:$0xff]  }
 0x29d   :  { %4960 = vpow2.f32 %v2064_v52  ;;  %v4757_v52 = vld [vmem:[%s6570_s7 + $0x194] ss:$28 sps:$4 sm:$0xff]  }
 0x2a7   :  { %v4961_v57 = vpop.eup %4960 }
 0x2a8   :  { %2067 = vrot.lane.b32.xlu0 %v4961_v57, %s5039_s13  ;;  %v4767_v57 = vld [vmem:[%s6570_s7 + $0x200] ss:$28 sps:$4 sm:$0xff]  }
 0x31a   :  { %v2068_v29 = vpop.permute.xlu0 %2067 }
 0x31b   :  { %v2070_v30 = vmul.f32 %v2068_v29, %v2062_v28 }
 0x31d   :  { %v2071_v32 = vadd.f32 %v2070_v30, %v5916_v49  ;;  %v4743_v49 = vld [vmem:[%s6570_s7 + $0x120] ss:$28 sps:$4 sm:$0xff]  }
 0x31e   :  { %v4806_v30 = vld [vmem:[%s6570_s7 + $0x380] ss:$28 sps:$4 sm:$0xff]  }
 0x31f   :  { %v2072_v34 = vpack.c.bf16 %v2071_v32, %v2071_v32  ;;  %v2096_v32 = vrot.slane %v6142_v17, %v5899_v10 }
 0x321   :  { %4049 = vmatmul.mubr.msk.bf16.vlgmr.msra.gmra.mrb[8].mxu1 %vm2131_vm2, %v2072_v34 }
 0x322   :  { %2190 = vmatpush1.bf16.msra.mxu1 %v4705_v33  ;;  %2221 = vmatprep.mubr.bf16.mxu1 %v5038_v21 }
 0x323   :  { %4050 = vmatprep.subr.msk.bf16.mxu1 %vm2135_vm1, %v4047_v35  ;;  %v4817_v35 = vld [vmem:[%s6570_s7 + $0x3c4] ss:$28 sps:$4 sm:$0xff]  }
 0x326   :  { %2192 = vmatpush1.bf16.msra.mxu1 %v2143_v37 }
 0x327   :  { %3460 = vmatprep.subr.bf16.mxu1 %v4715_v38 }
 0x329   :  { %4051 = vmatmul.mubr.msk.bf16.vlgmr.msra.gmra.mrb[12].mxu1 %vm2131_vm2, %v2072_v34  ;;  %v4814_v34 = vld [vmem:[%s6570_s7 + $0x3bc] ss:$28 sps:$4 sm:$0xff]  }
 0x32a   :  { %3461 = vmatpush1.bf16.msra.mxu1 %v4713_v39 }
 0x32b   :  { %3462 = vmatprep.subr.bf16.mxu1 %v4721_v40  ;;  %v4812_v40 = vld [vmem:[%s6570_s7 + $0x3b8] ss:$28 sps:$4 sm:$0xff]  }
 0x32e   :  { %3463 = vmatpush1.bf16.msra.mxu1 %v4719_v41  ;;  %v4815_v41 = vld [vmem:[%s6570_s7 + $0x3c0] ss:$28 sps:$4 sm:$0xff]  }
 0x32f   :  { %3464 = vmatprep.subr.bf16.mxu1 %v4727_v42 }
 0x332   :  { %3465 = vmatpush1.bf16.msra.mxu1 %v4725_v43  ;;  %v4820_v43 = vld [vmem:[%s6570_s7 + $0x3f4] ss:$28 sps:$4 sm:$0xff]  }
 0x333   :  { %3466 = vmatprep.subr.bf16.mxu1 %v4733_v44  ;;  %v4823_v44 = vld [vmem:[%s6570_s7 + $0x3fc] ss:$28 sps:$4 sm:$0xff]  }
 0x336   :  { %3467 = vmatpush1.bf16.msra.mxu1 %v4731_v45 }
 0x337   :  { %3468 = vmatprep.subr.bf16.mxu1 %v4739_v46 }
 0x33a   :  { %3469 = vmatpush1.bf16.msra.mxu1 %v4737_v47  ;;  %v4818_v47 = vld [vmem:[%s6570_s7 + $0x3f0] ss:$28 sps:$4 sm:$0xff]  }
 0x33b   :  { %3470 = vmatprep.subr.bf16.mxu1 %v4745_v48  ;;  %v4821_v48 = vld [vmem:[%s6570_s7 + $0x3f8] ss:$28 sps:$4 sm:$0xff]  }
 0x33e   :  { %3471 = vmatpush1.bf16.msra.mxu1 %v4743_v49  ;;  %v4826_v49 = vld [vmem:[%s6570_s7 + $0x42c] ss:$28 sps:$4 sm:$0xff]  }
 0x33f   :  { %3472 = vmatprep.subr.bf16.mxu1 %v4751_v50  ;;  %v4829_v50 = vld [vmem:[%s6570_s7 + $0x434] ss:$28 sps:$4 sm:$0xff]  }
 0x342   :  { %3473 = vmatpush1.bf16.msra.mxu1 %v4749_v51  ;;  %v4824_v51 = vld [vmem:[%s6570_s7 + $0x428] ss:$28 sps:$4 sm:$0xff]  }
 0x343   :  { %3474 = vmatprep.subr.bf16.mxu1 %v4757_v52  ;;  %v4827_v52 = vld [vmem:[%s6570_s7 + $0x430] ss:$28 sps:$4 sm:$0xff]  }
 0x346   :  { %3475 = vmatpush1.bf16.msra.mxu1 %v4755_v53  ;;  %v4832_v53 = vld [vmem:[%s6570_s7 + $0x464] ss:$28 sps:$4 sm:$0xff]  }
 0x347   :  { %3476 = vmatprep.subr.bf16.mxu1 %v4763_v54  ;;  %v4835_v54 = vld [vmem:[%s6570_s7 + $0x46c] ss:$28 sps:$4 sm:$0xff]  }
 0x34a   :  { %3477 = vmatpush1.bf16.msra.mxu1 %v4761_v55  ;;  %v4830_v55 = vld [vmem:[%s6570_s7 + $0x460] ss:$28 sps:$4 sm:$0xff]  }
 0x34b   :  { %3478 = vmatprep.subr.bf16.mxu1 %v4769_v56  ;;  %v4833_v56 = vld [vmem:[%s6570_s7 + $0x468] ss:$28 sps:$4 sm:$0xff]  }
 0x34e   :  { %3479 = vmatpush1.bf16.msra.mxu1 %v4767_v57  ;;  %v4838_v57 = vld [vmem:[%s6570_s7 + $0x49c] ss:$28 sps:$4 sm:$0xff]  }
 0x34f   :  { %3480 = vmatprep.subr.bf16.mxu1 %v4775_v58  ;;  %v4841_v58 = vld [vmem:[%s6570_s7 + $0x4a4] ss:$28 sps:$4 sm:$0xff]  }
 0x352   :  { %3481 = vmatpush1.bf16.msra.mxu1 %v4773_v59  ;;  %v4836_v59 = vld [vmem:[%s6570_s7 + $0x498] ss:$28 sps:$4 sm:$0xff]  }
 0x353   :  { %3482 = vmatprep.subr.bf16.mxu1 %v4781_v60  ;;  %v4839_v60 = vld [vmem:[%s6570_s7 + $0x4a0] ss:$28 sps:$4 sm:$0xff]  }
 0x356   :  { %3483 = vmatpush1.bf16.msra.mxu1 %v4779_v61  ;;  %v4844_v61 = vld [vmem:[%s6570_s7 + $0x4d4] ss:$28 sps:$4 sm:$0xff]  }
 0x357   :  { %3484 = vmatprep.subr.bf16.mxu1 %v4787_v62  ;;  %v4847_v62 = vld [vmem:[%s6570_s7 + $0x4dc] ss:$28 sps:$4 sm:$0xff]  }
 0x35a   :  { %3485 = vmatpush1.bf16.msra.mxu1 %v4785_v63  ;;  %v4842_v63 = vld [vmem:[%s6570_s7 + $0x4d0] ss:$28 sps:$4 sm:$0xff]  }
 0x35b   :  { %3486 = vmatprep.subr.bf16.mxu1 %v4793_v0  ;;  %v4845_v0 = vld [vmem:[%s6570_s7 + $0x4d8] ss:$28 sps:$4 sm:$0xff]  }
 0x35e   :  { %3487 = vmatpush1.bf16.msra.mxu1 %v4791_v1  ;;  %v2092_v1 = vrot.slane %v6142_v17, %v5890_v7  ;;  %v4862_v17 = vld [vmem:[%s6570_s7 + $0x14] ss:$28 sps:$4 sm:$0xff]  }
 0x35f   :  { %3488 = vmatprep.subr.bf16.mxu1 %v4799_v3  ;;  %v4853_v3 = vld [vmem:[%s6570_s7 + $0x514] ss:$28 sps:$4 sm:$0xff]  }
 0x362   :  { %3489 = vmatpush1.bf16.msra.mxu1 %v4797_v8  ;;  %v4851_v8 = vld [vmem:[%s6570_s7 + $0x510] ss:$28 sps:$4 sm:$0xff]  }
 0x363   :  { %3490 = vmatprep.subr.bf16.mxu1 %v4805_v13  ;;  %v4856_v13 = vld [vmem:[%s6570_s7 + $0x544] ss:$28 sps:$4 sm:$0xff]  }
 0x366   :  { %3491 = vmatpush1.bf16.msra.mxu1 %v4803_v15  ;;  %v4854_v15 = vld [vmem:[%s6570_s7 + $0x540] ss:$28 sps:$4 sm:$0xff]  }
 0x367   :  { %3501 = vmatprep.subr.bf16.mxu1 %v4811_v11 }
 0x3f4   :  { %v2182_v20 = vpop.f32.mrb[8].mxu1 }
 0x3f5   :  { %v2183_v22 = vadd.f32 %v2182_v20, %v2084_v18  ;;  %v2184_v23 = vpop.f32.mrb[9].mxu1  ;;  %v4863_v18 = vld [vmem:[%s6570_s7 + $0x1d8] ss:$28 sps:$4 sm:$0xff]  }
 0x3f6   :  { %v2185_v24 = vadd.f32 %v2184_v23, %v2088_v19  ;;  %v2186_v25 = vpop.f32.mrb[10].mxu1  ;;  %v4860_v19 = vld [vmem:[%s6570_s7 + $0x10] ss:$28 sps:$4 sm:$0xff]  }
 0x3f7   :  { %v2230_v26 = vmax.f32 %v2183_v22, 0.0  ;;  %v2187_v27 = vpop.f32.mrb[11].mxu1  ;;  %v4864_v22 = vld [vmem:[%s6570_s7 + $0x18] ss:$28 sps:$4 sm:$0xff]   ;;  %v4867_v23 = vld [vmem:[%s6570_s7 + $0x4c] ss:$28 sps:$4 sm:$0xff]  }
 0x3f8   :  { %v2231_v28 = vmax.f32 %v2185_v24, 0.0  ;;  %v4868_v24 = vld [vmem:[%s6570_s7 + $0x210] ss:$28 sps:$4 sm:$0xff]   ;;  %v4865_v25 = vld [vmem:[%s6570_s7 + $0x48] ss:$28 sps:$4 sm:$0xff]  }
 0x3f9   :  { %v6158_v33 = vpack.c.bf16 %v2230_v26, %v2230_v26  ;;  %v4869_v26 = vld [vmem:[%s6570_s7 + $0x50] ss:$28 sps:$4 sm:$0xff]   ;;  %v4872_v27 = vld [vmem:[%s6570_s7 + $0x84] ss:$28 sps:$4 sm:$0xff]  }
 0x3fa   :  { %v6148_v29 = vpack.c.bf16 %v2231_v28, %v2231_v28  ;;  %v4873_v28 = vld [vmem:[%s6570_s7 + $0x248] ss:$28 sps:$4 sm:$0xff]  }
 0x3fc   :  { %v6166_v36 = vpop.f32.mrb[12].mxu1  ;;  %3410 = vmatprep.mubr.bf16.mxu0 %v6148_v29  ;;  %3492 = vmatprep.mubr.bf16.mxu1 %v6148_v29 }
 0x3fd   :  { %v2225_v37 = vpop.f32.mrb[13].mxu1  ;;  %3411 = vmatmul.mubr.bf16.vlgmr.msra.gmra.mrb[8].mxu0 %v6158_v33  ;;  %3493 = vmatmul.mubr.bf16.vlgmr.msra.gmra.mrb[16].mxu1 %v6158_v33  ;;  %v2224_v12 = vadd.f32 %v6166_v36, %v2092_v1  ;;  %v4882_v36 = vld [vmem:[%s6570_s7 + $0xf4] ss:$28 sps:$4 sm:$0xff]  }
 0x3fe   :  { %v2226_v38 = vadd.f32 %v2225_v37, %v2096_v32  ;;  %3420 = vmatpush1.bf16.msra.mxu0 %v4806_v30  ;;  %3502 = vmatpush1.bf16.msra.mxu1 %v4809_v31  ;;  %v2227_v39 = vpop.f32.mrb[14].mxu1  ;;  %v4870_v30 = vld [vmem:[%s6570_s7 + $0x80] ss:$28 sps:$4 sm:$0xff]   ;;  %v4883_v37 = vld [vmem:[%s6570_s7 + $0x2b8] ss:$28 sps:$4 sm:$0xff]  }
 0x3ff   :  { %v2228_v42 = vpop.f32.mrb[15].mxu1  ;;  %3421 = vmatprep.subr.bf16.mxu0 %v4814_v34  ;;  %3503 = vmatprep.subr.bf16.mxu1 %v4817_v35  ;;  %v2232_v11 = vmax.f32 %v2224_v12, 0.0  ;;  %v4877_v31 = vld [vmem:[%s6570_s7 + $0xbc] ss:$28 sps:$4 sm:$0xff]   ;;  %v4918_v1 = vld [vmem:[%s6570_s7 + $0x2b4] ss:$28 sps:$4 sm:$0xff]  }
 0x400   :  { %v2233_v45 = vmax.f32 %v2226_v38, 0.0  ;;  %v4878_v32 = vld [vmem:[%s6570_s7 + $0x280] ss:$28 sps:$4 sm:$0xff]   ;;  %v4875_v34 = vld [vmem:[%s6570_s7 + $0xb8] ss:$28 sps:$4 sm:$0xff]  }
 0x401   :  { %v6280_v20 = vpack.c.bf16 %v2232_v11, %v2232_v11  ;;  %v4879_v35 = vld [vmem:[%s6570_s7 + $0xc0] ss:$28 sps:$4 sm:$0xff]   ;;  %v4880_v38 = vld [vmem:[%s6570_s7 + $0xf0] ss:$28 sps:$4 sm:$0xff]   ;;  %v4884_v39 = vld [vmem:[%s6570_s7 + $0xf8] ss:$28 sps:$4 sm:$0xff]  }
 0x402   :  { %v6184_v46 = vpack.c.bf16 %v2233_v45, %v2233_v45  ;;  %3422 = vmatpush1.bf16.msra.mxu0 %v4812_v40  ;;  %3504 = vmatpush1.bf16.msra.mxu1 %v4815_v41  ;;  %v4887_v40 = vld [vmem:[%s6570_s7 + $0x12c] ss:$28 sps:$4 sm:$0xff]   ;;  %v4928_v11 = vld [vmem:[%s6570_s7 + $0x358] ss:$28 sps:$4 sm:$0xff]  }
 0x403   :  { %3423 = vmatprep.subr.bf16.mxu0 %v4820_v43  ;;  %3505 = vmatprep.subr.bf16.mxu1 %v4823_v44  ;;  %v4888_v41 = vld [vmem:[%s6570_s7 + $0x2f0] ss:$28 sps:$4 sm:$0xff]   ;;  %v4885_v42 = vld [vmem:[%s6570_s7 + $0x128] ss:$28 sps:$4 sm:$0xff]  }
 0x404   :  { %4227 = vmatprep.mubr.msk.bf16.mxu0 %vm1978_vm0, %v6184_v46  ;;  %4228 = vmatprep.mubr.msk.bf16.mxu1 %vm1978_vm0, %v6184_v46  ;;  %v4889_v43 = vld [vmem:[%s6570_s7 + $0x130] ss:$28 sps:$4 sm:$0xff]   ;;  %v4892_v44 = vld [vmem:[%s6570_s7 + $0x164] ss:$28 sps:$4 sm:$0xff]  }
 0x405   :  { %v4893_v45 = vld [vmem:[%s6570_s7 + $0x328] ss:$28 sps:$4 sm:$0xff]   ;;  %v4923_v12 = vld [vmem:[%s6570_s7 + $0x4b0] ss:$28 sps:$4 sm:$0xff]  }
 0x406   :  { %3424 = vmatpush1.bf16.msra.mxu0 %v4818_v47  ;;  %3506 = vmatpush1.bf16.msra.mxu1 %v4821_v48  ;;  %v4890_v47 = vld [vmem:[%s6570_s7 + $0x160] ss:$28 sps:$4 sm:$0xff]   ;;  %v4894_v48 = vld [vmem:[%s6570_s7 + $0x168] ss:$28 sps:$4 sm:$0xff]  }
 0x407   :  { %3425 = vmatprep.subr.bf16.mxu0 %v4826_v49  ;;  %3507 = vmatprep.subr.bf16.mxu1 %v4829_v50  ;;  %v4897_v49 = vld [vmem:[%s6570_s7 + $0x19c] ss:$28 sps:$4 sm:$0xff]  }
 0x408   :  { %v4898_v50 = vld [vmem:[%s6570_s7 + $0x360] ss:$28 sps:$4 sm:$0xff]  }
 0x40a   :  { %3426 = vmatpush1.bf16.msra.mxu0 %v4824_v51  ;;  %3508 = vmatpush1.bf16.msra.mxu1 %v4827_v52  ;;  %v4895_v51 = vld [vmem:[%s6570_s7 + $0x198] ss:$28 sps:$4 sm:$0xff]   ;;  %v4899_v52 = vld [vmem:[%s6570_s7 + $0x1a0] ss:$28 sps:$4 sm:$0xff]  }
 0x40b   :  { %3427 = vmatprep.subr.bf16.mxu0 %v4832_v53  ;;  %3509 = vmatprep.subr.bf16.mxu1 %v4835_v54  ;;  %v4902_v53 = vld [vmem:[%s6570_s7 + $0x1d4] ss:$28 sps:$4 sm:$0xff]  }
 0x40c   :  { %v4900_v54 = vld [vmem:[%s6570_s7 + $0x1d0] ss:$28 sps:$4 sm:$0xff]  }
 0x40e   :  { %3428 = vmatpush1.bf16.msra.mxu0 %v4830_v55  ;;  %3510 = vmatpush1.bf16.msra.mxu1 %v4833_v56  ;;  %v4903_v55 = vld [vmem:[%s6570_s7 + $0x398] ss:$28 sps:$4 sm:$0xff]   ;;  %v4906_v56 = vld [vmem:[%s6570_s7 + $0x20c] ss:$28 sps:$4 sm:$0xff]  }
 0x40f   :  { %3429 = vmatprep.subr.bf16.mxu0 %v4838_v57  ;;  %3511 = vmatprep.subr.bf16.mxu1 %v4841_v58  ;;  %v4904_v57 = vld [vmem:[%s6570_s7 + $0x208] ss:$28 sps:$4 sm:$0xff]   ;;  %v4907_v58 = vld [vmem:[%s6570_s7 + $0x3d0] ss:$28 sps:$4 sm:$0xff]  }
 0x412   :  { %3430 = vmatpush1.bf16.msra.mxu0 %v4836_v59  ;;  %3512 = vmatpush1.bf16.msra.mxu1 %v4839_v60  ;;  %v4910_v59 = vld [vmem:[%s6570_s7 + $0x244] ss:$28 sps:$4 sm:$0xff]  }
 0x413   :  { %3431 = vmatprep.subr.bf16.mxu0 %v4844_v61  ;;  %3513 = vmatprep.subr.bf16.mxu1 %v4847_v62  ;;  %v4908_v60 = vld [vmem:[%s6570_s7 + $0x240] ss:$28 sps:$4 sm:$0xff]   ;;  %v4911_v61 = vld [vmem:[%s6570_s7 + $0x408] ss:$28 sps:$4 sm:$0xff]  }
 0x414   :  { %v4914_v62 = vld [vmem:[%s6570_s7 + $0x27c] ss:$28 sps:$4 sm:$0xff]  }
 0x416   :  { %3432 = vmatpush1.bf16.msra.mxu0 %v4842_v63  ;;  %3514 = vmatpush1.bf16.msra.mxu1 %v4845_v0  ;;  %v4912_v63 = vld [vmem:[%s6570_s7 + $0x278] ss:$28 sps:$4 sm:$0xff]   ;;  %v4915_v0 = vld [vmem:[%s6570_s7 + $0x440] ss:$28 sps:$4 sm:$0xff]  }
 0x417   :  { %3433 = vmatprep.subr.bf16.mxu0 %v4850_v2  ;;  %3515 = vmatprep.subr.bf16.mxu1 %v4853_v3  ;;  %v4916_v2 = vld [vmem:[%s6570_s7 + $0x2b0] ss:$28 sps:$4 sm:$0xff]   ;;  %v4919_v3 = vld [vmem:[%s6570_s7 + $0x478] ss:$28 sps:$4 sm:$0xff]  }
 0x41a   :  { %3434 = vmatpush1.bf16.msra.mxu0 %v4848_v4  ;;  %3516 = vmatpush1.bf16.msra.mxu1 %v4851_v8  ;;  %v4922_v4 = vld [vmem:[%s6570_s7 + $0x2ec] ss:$28 sps:$4 sm:$0xff]  }
 0x41b   :  { %3435 = vmatprep.subr.bf16.mxu0 %v4856_v13  ;;  %3517 = vmatprep.subr.bf16.mxu1 %v4859_v14  ;;  %v4920_v8 = vld [vmem:[%s6570_s7 + $0x2e8] ss:$28 sps:$4 sm:$0xff]   ;;  %v4924_v14 = vld [vmem:[%s6570_s7 + $0x320] ss:$28 sps:$4 sm:$0xff]  }
 0x41c   :  { %v4926_v13 = vld [vmem:[%s6570_s7 + $0x324] ss:$28 sps:$4 sm:$0xff]  }
 0x41e   :  { %3436 = vmatpush1.bf16.msra.mxu0 %v4854_v15  ;;  %3518 = vmatpush1.bf16.msra.mxu1 %v4857_v16  ;;  %v4927_v15 = vld [vmem:[%s6570_s7 + $0x4e8] ss:$28 sps:$4 sm:$0xff]   ;;  %v4930_v16 = vld [vmem:[%s6570_s7 + $0x35c] ss:$28 sps:$4 sm:$0xff]  }
 0x41f   :  { %3542 = vmatprep.subr.bf16.mxu0 %v4862_v17  ;;  %4260 = vmatprep.subr.bf16.mxu1 %v4863_v18  ;;  %v4931_v17 = vld [vmem:[%s6570_s7 + $0x520] ss:$28 sps:$4 sm:$0xff]   ;;  %v4934_v18 = vld [vmem:[%s6570_s7 + $0x394] ss:$28 sps:$4 sm:$0xff]  }
 0x421   :  { %3452 = vmatmul.mubr.bf16.vlgmr.msra.gmra.mrb[8].mxu0 %v6280_v20  ;;  %3534 = vmatmul.mubr.bf16.vlgmr.msra.gmra.mrb[16].mxu1 %v6280_v20 }
 0x422   :  { %3543 = vmatpush1.bf16.msra.mxu0 %v4860_v19  ;;  %3574 = vmatprep.mubr.bf16.mxu0 %v6148_v29  ;;  %v4932_v19 = vld [vmem:[%s6570_s7 + $0x390] ss:$28 sps:$4 sm:$0xff]  }
 0x423   :  { %4261 = vmatpush3.bf16.msra.mxu1 %v4864_v22  ;;  %3656 = vmatprep.mubr.bf16.mxu1 %v6148_v29  ;;  %v4874_v29 = vld [vmem:[%s6570_s7 + $0x88] ss:$28 sps:$4 sm:$0xff]   ;;  %v4935_v22 = vld [vmem:[%s6570_s7 + $0x558] ss:$28 sps:$4 sm:$0xff]  }
 0x424   :  { %3544 = vmatprep.subr.bf16.mxu0 %v4867_v23  ;;  %4262 = vmatprep.subr.bf16.mxu1 %v4868_v24  ;;  %v4938_v23 = vld [vmem:[%s6570_s7 + $0x3cc] ss:$28 sps:$4 sm:$0xff]  }
 0x425   :  { %v4936_v24 = vld [vmem:[%s6570_s7 + $0x3c8] ss:$28 sps:$4 sm:$0xff]  }
 0x426   :  { %3545 = vmatpush1.bf16.msra.mxu0 %v4865_v25  ;;  %v4941_v25 = vld [vmem:[%s6570_s7 + $0x404] ss:$28 sps:$4 sm:$0xff]  }
 0x427   :  { %4263 = vmatpush3.bf16.msra.mxu1 %v4869_v26  ;;  %3546 = vmatprep.subr.bf16.mxu0 %v4872_v27  ;;  %v4947_v26 = vld [vmem:[%s6570_s7 + $0x474] ss:$28 sps:$4 sm:$0xff]  }
 0x428   :  { %4264 = vmatprep.subr.bf16.mxu1 %v4873_v28  ;;  %v4945_v27 = vld [vmem:[%s6570_s7 + $0x470] ss:$28 sps:$4 sm:$0xff]  }
 0x429   :  { %v4950_v28 = vld [vmem:[%s6570_s7 + $0x4ac] ss:$28 sps:$4 sm:$0xff]  }
 0x42a   :  { %3547 = vmatpush1.bf16.msra.mxu0 %v4870_v30  ;;  %v4948_v30 = vld [vmem:[%s6570_s7 + $0x4a8] ss:$28 sps:$4 sm:$0xff]  }
 0x42b   :  { %4265 = vmatpush3.bf16.msra.mxu1 %v4874_v29  ;;  %3548 = vmatprep.subr.bf16.mxu0 %v4877_v31  ;;  %v4953_v29 = vld [vmem:[%s6570_s7 + $0x4e4] ss:$28 sps:$4 sm:$0xff]  }
 0x42c   :  { %4266 = vmatprep.subr.bf16.mxu1 %v4878_v32  ;;  %v4951_v31 = vld [vmem:[%s6570_s7 + $0x4e0] ss:$28 sps:$4 sm:$0xff]  }
 0x42d   :  { %v4956_v32 = vld [vmem:[%s6570_s7 + $0x51c] ss:$28 sps:$4 sm:$0xff]  }
 0x42e   :  { %3549 = vmatpush1.bf16.msra.mxu0 %v4875_v34  ;;  %v4954_v34 = vld [vmem:[%s6570_s7 + $0x518] ss:$28 sps:$4 sm:$0xff]  }
 0x42f   :  { %4267 = vmatpush3.bf16.msra.mxu1 %v4879_v35  ;;  %3550 = vmatprep.subr.bf16.mxu0 %v4882_v36  ;;  %v4959_v35 = vld [vmem:[%s6570_s7 + $0x554] ss:$28 sps:$4 sm:$0xff]  }
 0x430   :  { %4268 = vmatprep.subr.bf16.mxu1 %v4883_v37  ;;  %v4957_v36 = vld [vmem:[%s6570_s7 + $0x550] ss:$28 sps:$4 sm:$0xff]   ;;  %v6522_v37 = vld [vmem:[%s6571_s8] sm:$0x7f] }
 0x432   :  { %3551 = vmatpush1.bf16.msra.mxu0 %v4880_v38  ;;  %v2443_v38 = vrot.slane %v6522_v37, %v5887_v6 }
 0x433   :  { %4269 = vmatpush3.bf16.msra.mxu1 %v4884_v39  ;;  %3552 = vmatprep.subr.bf16.mxu0 %v4887_v40  ;;  %v2451_v39 = vrot.slane %v6522_v37, %v5890_v7  ;;  %v2447_v40 = vrot.slane %v6522_v37, %v5896_v9 }
 0x434   :  { %4270 = vmatprep.subr.bf16.mxu1 %v4888_v41  ;;  %v2455_v41 = vrot.slane %v6522_v37, %v5899_v10 }
 0x436   :  { %3553 = vmatpush1.bf16.msra.mxu0 %v4885_v42 }
 0x437   :  { %4271 = vmatpush3.bf16.msra.mxu1 %v4889_v43  ;;  %3554 = vmatprep.subr.bf16.mxu0 %v4892_v44 }
 0x438   :  { %4272 = vmatprep.subr.bf16.mxu1 %v4893_v45 }
 0x43a   :  { %3555 = vmatpush1.bf16.msra.mxu0 %v4890_v47 }
 0x43b   :  { %4273 = vmatpush3.bf16.msra.mxu1 %v4894_v48  ;;  %3556 = vmatprep.subr.bf16.mxu0 %v4897_v49 }
 0x43c   :  { %4274 = vmatprep.subr.bf16.mxu1 %v4898_v50 }
 0x43e   :  { %3557 = vmatpush1.bf16.msra.mxu0 %v4895_v51 }
 0x43f   :  { %4275 = vmatpush3.bf16.msra.mxu1 %v4899_v52  ;;  %3558 = vmatprep.subr.bf16.mxu0 %v4902_v53 }
 0x440   :  { %3664 = vmatprep.subr.bf16.mxu1 %v5038_v21 }
 0x442   :  { %3657 = vmatmul.mubr.bf16.vlgmr.msra.gmra.mrb[20].mxu1 %v6158_v33  ;;  %3559 = vmatpush1.bf16.msra.mxu0 %v4900_v54 }
 0x443   :  { %3665 = vmatpush1.bf16.msra.mxu1 %v4903_v55  ;;  %4230 = vmatprep.mubr.msk.bf16.mxu1 %vm1978_vm0, %v6184_v46 }
 0x444   :  { %3560 = vmatprep.subr.bf16.mxu0 %v4906_v56  ;;  %3666 = vmatprep.subr.bf16.mxu1 %v5038_v21 }
 0x446   :  { %3561 = vmatpush1.bf16.msra.mxu0 %v4904_v57 }
 0x447   :  { %3667 = vmatpush1.bf16.msra.mxu1 %v4907_v58  ;;  %3562 = vmatprep.subr.bf16.mxu0 %v4910_v59 }
 0x448   :  { %3668 = vmatprep.subr.bf16.mxu1 %v5038_v21 }
 0x44a   :  { %3563 = vmatpush1.bf16.msra.mxu0 %v4908_v60 }
 0x44b   :  { %3669 = vmatpush1.bf16.msra.mxu1 %v4911_v61  ;;  %3564 = vmatprep.subr.bf16.mxu0 %v4914_v62 }
 0x44c   :  { %3670 = vmatprep.subr.bf16.mxu1 %v5038_v21 }
 0x44e   :  { %3565 = vmatpush1.bf16.msra.mxu0 %v4912_v63 }
 0x44f   :  { %3671 = vmatpush1.bf16.msra.mxu1 %v4915_v0  ;;  %3566 = vmatprep.subr.bf16.mxu0 %v4918_v1 }
 0x450   :  { %3672 = vmatprep.subr.bf16.mxu1 %v5038_v21 }
 0x452   :  { %3567 = vmatpush1.bf16.msra.mxu0 %v4916_v2 }
 0x453   :  { %3673 = vmatpush1.bf16.msra.mxu1 %v4919_v3  ;;  %3568 = vmatprep.subr.bf16.mxu0 %v4922_v4 }
 0x454   :  { %3674 = vmatprep.subr.bf16.mxu1 %v5038_v21 }
 0x456   :  { %3569 = vmatpush1.bf16.msra.mxu0 %v4920_v8 }
 0x457   :  { %3675 = vmatpush1.bf16.msra.mxu1 %v4923_v12  ;;  %3570 = vmatprep.subr.bf16.mxu0 %v4926_v13 }
 0x458   :  { %3676 = vmatprep.subr.bf16.mxu1 %v5038_v21 }
 0x45a   :  { %3571 = vmatpush1.bf16.msra.mxu0 %v4924_v14 }
 0x45b   :  { %3677 = vmatpush1.bf16.msra.mxu1 %v4927_v15  ;;  %3572 = vmatprep.subr.bf16.mxu0 %v4930_v16 }
 0x45c   :  { %3678 = vmatprep.subr.bf16.mxu1 %v5038_v21 }
 0x45e   :  { %3573 = vmatpush1.bf16.msra.mxu0 %v4928_v11 }
 0x45f   :  { %3679 = vmatpush1.bf16.msra.mxu1 %v4931_v17  ;;  %3583 = vmatprep.subr.bf16.mxu0 %v4934_v18 }
 0x460   :  { %3680 = vmatprep.subr.bf16.mxu1 %v5038_v21  ;;  %v4939_v21 = vld [vmem:[%s6570_s7 + $0x400] ss:$28 sps:$4 sm:$0xff]  }
 0x461   :  { %3575 = vmatmul.mubr.bf16.vlgmr.msra.gmra.mrb[12].mxu0 %v6158_v33  ;;  %v4944_v33 = vld [vmem:[%s6570_s7 + $0x43c] ss:$28 sps:$4 sm:$0xff]  }
 0x462   :  { %3584 = vmatpush1.bf16.msra.mxu0 %v4932_v19  ;;  %4229 = vmatprep.mubr.msk.bf16.mxu0 %vm1978_vm0, %v6184_v46  ;;  %v4942_v46 = vld [vmem:[%s6570_s7 + $0x438] ss:$28 sps:$4 sm:$0xff]   ;;  %s5040_s7 = smov [#allocation4]  }
 0x463   :  { %3681 = vmatpush1.bf16.msra.mxu1 %v4935_v22  ;;  %3585 = vmatprep.subr.bf16.mxu0 %v4938_v23  ;;  %s3770_s8 = sshll.u32 %s5040_s7, 4  ;;  %s3771_s8 = int_to_ptr.vmem [resolvable:$true] %s3770_s8 }
 0x464   :  { %s4990_s26 = scalar_lea.vmem %s3771_s8, 128  ;;  %p4995_p1 = scmp.lt.s32.totalorder %s3771_s8, %s3771_s8 }
 0x465   :  { %p4991_p0 = scmp.ne.s32.totalorder %s3771_s8, %s4990_s26  ;;  %p4996_p2 = scmp.lt.s32.totalorder %s4990_s26, %s4990_s26 }
 0x466   :  { %3697 = vmatmul.mubr.bf16.vlgmr.msra.gmra.mrb[24].mxu1 %v6280_v20  ;;  %3586 = vmatpush1.bf16.msra.mxu0 %v4936_v24 }
 0x467   :  { %3587 = vmatprep.subr.bf16.mxu0 %v4941_v25  ;;  %p4997_p3 = por %p4996_p2, %p4995_p1 }
 0x469   :  { %p4998_p4 = pnand %p4997_p3, %p4991_p0 }
 0x46a   :  { %3588 = vmatpush1.bf16.msra.mxu0 %v4939_v21 }
 0x46b   :  { %3589 = vmatprep.subr.bf16.mxu0 %v4944_v33 }
 0x46e   :  { %3590 = vmatpush1.bf16.msra.mxu0 %v4942_v46 }
 0x46f   :  { %3591 = vmatprep.subr.bf16.mxu0 %v4947_v26 }
 0x472   :  { %3592 = vmatpush1.bf16.msra.mxu0 %v4945_v27 }
 0x473   :  { %3593 = vmatprep.subr.bf16.mxu0 %v4950_v28 }
 0x476   :  { %3594 = vmatpush1.bf16.msra.mxu0 %v4948_v30 }
 0x477   :  { %3595 = vmatprep.subr.bf16.mxu0 %v4953_v29 }
 0x47a   :  { %3596 = vmatpush1.bf16.msra.mxu0 %v4951_v31 }
 0x47b   :  { %3597 = vmatprep.subr.bf16.mxu0 %v4956_v32 }
 0x47e   :  { %3598 = vmatpush1.bf16.msra.mxu0 %v4954_v34 }
 0x47f   :  { %3599 = vmatprep.subr.bf16.mxu0 %v4959_v35 }
 0x482   :  { %3600 = vmatpush1.bf16.msra.mxu0 %v4957_v36 }
 0x485   :  { %3616 = vmatmul.mubr.bf16.vlgmr.msra.gmra.mrb[12].mxu0 %v6280_v20 }
 0x4f4   :  { %v3453_v42 = vpop.f32.mrb[8].mxu0  ;;  %v3535_v43 = vpop.f32.mrb[16].mxu1 }
 0x4f5   :  { %v4286_v20 = vadd.f32 %v3453_v42, %v2443_v38  ;;  %v4288_v44 = vadd.f32 %v3535_v43, %v2451_v39  ;;  %v3455_v45 = vpop.f32.mrb[9].mxu0  ;;  %v3537_v47 = vpop.f32.mrb[17].mxu1 }
 0x4f6   :  { %v4287_v48 = vadd.f32 %v3455_v45, %v2447_v40  ;;  %v4289_v49 = vadd.f32 %v3537_v47, %v2455_v41  ;;  %v3457_v50 = vpop.f32.mrb[10].mxu0  ;;  %v3539_v51 = vpop.f32.mrb[18].mxu1 }
 0x4f7   :  { %v4231_v6 = vmul.f32 -1.442695, %v4286_v20  ;;  %v4233_v52 = vmul.f32 -1.442695, %v4288_v44  ;;  %v3458_v53 = vpop.f32.mrb[11].mxu0  ;;  %v3540_v7 = vpop.f32.mrb[19].mxu1 }
 0x4f8   :  { %v4232_v54 = vmul.f32 -1.442695, %v4287_v48  ;;  %v4234_v55 = vmul.f32 -1.442695, %v4289_v49 }
 0x4f9   :  { %4962 = vpow2.f32 %v4231_v6 }
 0x4fa   :  { %4964 = vpow2.f32 %v4233_v52 }
 0x4fb   :  { %5001 = shalt.err (!%p4998_p4)
}
 0x4fc   :  { %s5002_s28 = scalar_lea.hbm %s6574_s11, 128 }
 0x4fd   :  { %p5003_p5 = scmp.ne.s32.totalorder %s6574_s11, %s5002_s28  ;;  %p5006_p6 = scmp.lt.u32.totalorder %s5002_s28, %s6574_s11 }
 0x4ff   :  { %p5008_p7 = pnand %p5006_p6, %p5003_p5 }
 0x501   :  { %5011 = shalt.err (!%p5008_p7)
}
 0x502   :  { %3773 = dma.vmem_to_hbm [thread:$0]  %s3771_s8, 128, %s6574_s11, [#allocation5]   ;;  %4966 = vpow2.f32 %v4232_v54  ;;  %v2466_v13 = vsub.s32 6, %v5884_v5  ;;  %v2458_v25 = vsub.s32 4, %v5884_v5  ;;  %v2462_v21 = vsub.s32 5, %v5884_v5 }
 0x503   :  { %4968 = vpow2.f32 %v4234_v55  ;;  %v4963_v9 = vpop.eup %4962  ;;  %s5041_s11 = smov [#allocation2]  }
 0x504   :  { %v4965_v10 = vpop.eup %4964  ;;  %v3725_v56 = vadd.f32 1.0, %v4963_v9  ;;  %v2467_v14 = vrot.slane %v6522_v37, %v2466_v13  ;;  %v2459_v46 = vrot.slane %v6522_v37, %v2458_v25  ;;  %v2463_v26 = vrot.slane %v6522_v37, %v2462_v21  ;;  %s3760_s15 = sshll.u32 %s5041_s11, 4  ;;  %s3761_s15 = int_to_ptr.vmem [resolvable:$true] %s3760_s15 }
 0x505   :  { %v3727_v58 = vadd.f32 1.0, %v4965_v10  ;;  %s5012_s16 = scalar_lea.vmem %s3761_s15, 896  ;;  %p5017_p9 = scmp.lt.s32.totalorder %s3761_s15, %s3761_s15 }
 0x506   :  { %4970 = vrcp.f32 %v3725_v56  ;;  %p5013_p8 = scmp.ne.s32.totalorder %s3761_s15, %s5012_s16  ;;  %p5018_p10 = scmp.lt.s32.totalorder %s5012_s16, %s5012_s16 }
 0x507   :  { %4972 = vrcp.f32 %v3727_v58 }
 0x508   :  { %p5019_p11 = por %p5018_p10, %p5017_p9 }
 0x50a   :  { %p5020_p12 = pnand %p5019_p11, %p5013_p8 }
 0x50c   :  { %v4967_v57 = vpop.eup %4966 }
 0x50d   :  { %v4969_v59 = vpop.eup %4968  ;;  %v3726_v60 = vadd.f32 1.0, %v4967_v57 }
 0x50e   :  { %v3728_v61 = vadd.f32 1.0, %v4969_v59 }
 0x50f   :  { %4974 = vrcp.f32 %v3726_v60 }
 0x510   :  { %4976 = vrcp.f32 %v3728_v61  ;;  %v4971_v62 = vpop.eup %4970 }
 0x511   :  { %v4973_v63 = vpop.eup %4972  ;;  %3746 = vst [vmem:[#allocation2] sm:$0xff] %v4971_v62 }
 0x512   :  { %3748 = vst [vmem:[#allocation2 + $0x10] sm:$0xff] %v4973_v63 }
 0x515   :  { %v4276_v2 = vpop.f32.mrb[20].mxu1 }
 0x516   :  { %v4277_v3 = vpop.f32.mrb[21].mxu1 }
 0x517   :  { %v4278_v4 = vadd.f32 %v4277_v3, %v4276_v2  ;;  %v4279_v8 = vpop.f32.mrb[22].mxu1 }
 0x518   :  { %v4280_v12 = vpop.f32.mrb[23].mxu1 }
 0x519   :  { %v4975_v0 = vpop.eup %4974  ;;  %v3659_v15 = vadd.f32 %v4278_v4, %v2467_v14 }
 0x51a   :  { %v4977_v1 = vpop.eup %4976  ;;  %3747 = vst [vmem:[#allocation2 + $0x8] sm:$0xff] %v4975_v0 }
 0x51b   :  { %3749 = vst [vmem:[#allocation2 + $0x18] sm:$0xff] %v4977_v1 }
 0x539   :  { %v3698_v16 = vpop.f32.mrb[24].mxu1 }
 0x53a   :  { %v3699_v11 = vadd.f32 %v3698_v16, %v3659_v15  ;;  %v3700_v17 = vpop.f32.mrb[25].mxu1 }
 0x53b   :  { %v3701_v18 = vpop.f32.mrb[26].mxu1 }
 0x53c   :  { %v4237_v19 = vmul.f32 -1.442695, %v3699_v11  ;;  %v3702_v22 = vpop.f32.mrb[27].mxu1 }
 0x53e   :  { %4978 = vpow2.f32 %v4237_v19 }
 0x548   :  { %v4979_v23 = vpop.eup %4978 }
 0x549   :  { %v3731_v24 = vadd.f32 1.0, %v4979_v23 }
 0x54b   :  { %4980 = vrcp.f32 %v3731_v24 }
 0x555   :  { %v4981_v33 = vpop.eup %4980 }
 0x556   :  { %3752 = vst.msk [vmem:[#allocation2 + $0x30] sm:$0xff] %vm1978_vm0, %v4981_v33 }
 0x558   :  { %v3617_v27 = vpop.f32.mrb[12].mxu0 }
 0x559   :  { %v4290_v28 = vadd.f32 %v3617_v27, %v2459_v46  ;;  %v3619_v30 = vpop.f32.mrb[13].mxu0 }
 0x55a   :  { %v4291_v29 = vadd.f32 %v3619_v30, %v2463_v26  ;;  %v3621_v31 = vpop.f32.mrb[14].mxu0 }
 0x55b   :  { %v4235_v32 = vmul.f32 -1.442695, %v4290_v28  ;;  %v3622_v34 = vpop.f32.mrb[15].mxu0 }
 0x55c   :  { %v4236_v35 = vmul.f32 -1.442695, %v4291_v29 }
 0x55d   :  { %4982 = vpow2.f32 %v4235_v32 }
 0x55e   :  { %4984 = vpow2.f32 %v4236_v35 }
 0x567   :  { %v4983_v36 = vpop.eup %4982 }
 0x568   :  { %v4985_v38 = vpop.eup %4984  ;;  %v3729_v5 = vadd.f32 1.0, %v4983_v36 }
 0x569   :  { %v3730_v39 = vadd.f32 1.0, %v4985_v38 }
 0x56a   :  { %4986 = vrcp.f32 %v3729_v5 }
 0x56b   :  { %4988 = vrcp.f32 %v3730_v39 }
 0x574   :  { %v4987_v40 = vpop.eup %4986 }
 0x575   :  { %v4989_v37 = vpop.eup %4988  ;;  %3750 = vst [vmem:[#allocation2 + $0x20] sm:$0xff] %v4987_v40 }
 0x576   :  { %3751 = vst [vmem:[#allocation2 + $0x28] sm:$0xff] %v4989_v37 }
 0x577   :  { %5023 = shalt.err (!%p5020_p12)
}
 0x578   :  { %s5024_s19 = scalar_lea.hbm %s6573_s10, 896 }
 0x579   :  { %p5025_p13 = scmp.ne.s32.totalorder %s6573_s10, %s5024_s19  ;;  %p5028_p0 = scmp.lt.u32.totalorder %s5024_s19, %s6573_s10 }
 0x57b   :  { %p5030_p1 = pnand %p5028_p0, %p5025_p13 }
 0x57d   :  { %5033 = shalt.err (!%p5030_p1)
}
 0x57e   :  { %3763 = dma.vmem_to_hbm [thread:$0]  %s3761_s15, 896, %s6573_s10, [#allocation3]  }
 0x57f   :  { %5034 = dma.done.wait [#allocation3], 896  }
 0x580   :  { %5035 = vsyncadd [#allocation3], 4294966400 }
 0x581   :  { %5036 = dma.done.wait [#allocation5], 128  }
 0x582   :  { %5037 = vsyncadd [#allocation5], 4294967168 }
 0x583   :  { %3780 = vsyncpa [#allocation3], 1 }
 0x584   :  { %3781 = vsyncpa [#allocation5], 1 }

</bundles_post_ra>
